<compile_context>
chip_gen: v7x
topology: tpu7x:2x2x1
jax: 0.10.0
libtpu: 0.0.40
codegen_flags: <defaults>
</compile_context>

<pallas_src>
import math
import functools

import jax
import jax.numpy as jnp
from jax import lax
from jax.experimental import pallas as pl
from jax.experimental.pallas import tpu as pltpu


def _round_up(x, m):
    return (x + m - 1) // m * m


def _pick_time_block(T, time_block):
    """Timesteps per grid step. Prefer a divisor of T so no tail padding is needed."""
    tb = max(1, min(int(time_block), T))
    if T % tb == 0:
        return tb
    best = 1
    for cand in range(tb, 0, -1):
        if T % cand == 0:
            best = cand
            break
    if best >= max(4, tb // 4):
        return best          # good divisor -> no padding / masking at all
    return tb                # fall back to padding (handled via saturated gates)


def _lstm_kernel(xu_ref, wT_ref, h0_ref, c0_ref,
                 h_out_ref, c_out_ref,
                 h_sc, c_sc,
                 *, Tt, Dh, unroll):
    """Grid = (batch_blocks, time_chunks). One call = Tt timesteps of one batch block.

    xu_ref : (Tt, Bb, 4*Dhp)  precomputed X@U chunk (pipelined)
    wT_ref : (Dhp, 4*Dhp)     W pre-transposed, whole-array VMEM resident (bf16 by default)
    h0/c0  : (Bb, Dhp)        initial state for this batch block
    h_out  : (Tt, Bb, Dhp)    per-chunk hidden states (lane-dense writeback)
    c_out  : (Bb, Dhp)        final cell state (written on last time chunk only)
    """
    t_chunk = pl.program_id(1)

    @pl.when(t_chunk == 0)
    def _():
        h_sc[...] = h0_ref[...].astype(jnp.float32)
        c_sc[...] = c0_ref[...].astype(jnp.float32)

    mm_dtype = wT_ref.dtype

    def step(s, carry):
        h, c = carry
        # Recurrent matmul only (XU term is a load). LHS cast to the weight's
        # dtype (bf16 by default); f32 accumulation; weight streamed from VMEM.
        gates = (xu_ref[s].astype(jnp.float32)
                 + jnp.dot(h.astype(mm_dtype), wT_ref[...],
                           preferred_element_type=jnp.float32))
        i_g = jax.nn.sigmoid(gates[:, 0 * Dh:1 * Dh])   # Dh = padded -> 128-lane aligned slices
        f_g = jax.nn.sigmoid(gates[:, 1 * Dh:2 * Dh])
        g_g = jnp.tanh(gates[:, 2 * Dh:3 * Dh])
        o_g = jax.nn.sigmoid(gates[:, 3 * Dh:4 * Dh])
        c_new = f_g * c + i_g * g_g
        h_new = o_g * jnp.tanh(c_new)
        h_out_ref[s] = h_new.astype(h_out_ref.dtype)
        return h_new, c_new

    h_fin, c_fin = lax.fori_loop(0, Tt, step, (h_sc[...], c_sc[...]),
                                 unroll=unroll)
    h_sc[...] = h_fin
    c_sc[...] = c_fin

    @pl.when(t_chunk == pl.num_programs(1) - 1)
    def _():
        c_out_ref[...] = c_fin.astype(c_out_ref.dtype)


@functools.partial(
    jax.jit,
    static_argnames=("time_block", "batch_blocks", "recurrent_dtype", "xu_dtype"))
def cache_lstm_forward(X, U, W, h0, c0, *, time_block=32, batch_blocks=1,
                       recurrent_dtype="bfloat16", xu_dtype=None):
    """X: (T, B, Di), U: (Di, 4*Dh), W: (4*Dh, Dh), h0/c0: (B, Dh).

    Returns (h: (T, B, Dh), cT: (B, Dh)).
      batch_blocks : set to 2 on v7x to shard the batch across both TensorCores.
      recurrent_dtype : dtype of the h_{t-1} @ W^T matmul ("bfloat16" or "float32").
      xu_dtype : optional storage dtype for the streamed XU (e.g. "bfloat16" on
                 HBM-bound v5e); default keeps X.dtype.
    """
    T, B, Di = X.shape
    Dh = W.shape[1]
    assert U.shape == (Di, 4 * Dh)
    assert W.shape == (4 * Dh, Dh)
    assert h0.shape == (B, Dh) and c0.shape == (B, Dh)

    rdt = jnp.dtype(recurrent_dtype)
    Dhp = _round_up(Dh, 128)                       # lane-aligned gate blocks
    n_bblocks = max(1, int(batch_blocks))
    Bb = _round_up(-(-B // n_bblocks), 8)          # per-block batch rows (sublane aligned)
    Bp = Bb * n_bblocks

    Tt = _pick_time_block(T, time_block)
    Tp = _round_up(T, Tt)
    n_chunks = Tp // Tt
    unroll = min(8, Tt)                            # partial unroll: LLO visibility w/o spills

    # Pad U along the per-gate hidden dim so each gate occupies full 128-lane blocks.
    U_p = jnp.pad(U.reshape(Di, 4, Dh),
                  ((0, 0), (0, 0), (0, Dhp - Dh))).reshape(Di, 4 * Dhp)
    # Pre-transpose + pad W -> (Dhp, 4*Dhp), cast to the recurrent matmul dtype.
    # Zero padding keeps padded gate columns exactly 0, so padded h/c lanes stay 0.
    W_T = jnp.pad(W.T.reshape(Dh, 4, Dh),
                  ((0, Dhp - Dh), (0, 0), (0, Dhp - Dh))).reshape(Dhp, 4 * Dhp).astype(rdt)

    # Input projection hoisted out of the serial recurrence: one large parallel
    # matmul (mirrors the original cache_lstm.forward(XU, W, h0, c0)).
    X_b = jnp.pad(X, ((0, 0), (0, Bp - B), (0, 0)))
    xu_store_dtype = X.dtype if xu_dtype is None else jnp.dtype(xu_dtype)
    XU = jnp.einsum("tbi,ig->tbg", X_b, U_p,
                    preferred_element_type=jnp.float32).astype(xu_store_dtype)
    if Tp != T:
        # Padded tail timesteps: saturate i-gate to 0 and f-gate to 1 so the cell
        # state passes through *exactly* -> no per-step masking inside the kernel.
        big = jnp.float32(1e9)
        tail_row = jnp.concatenate([
            jnp.full((Dhp,), -big, jnp.float32),     # i gate -> sigmoid -> 0
            jnp.full((Dhp,), big, jnp.float32),      # f gate -> sigmoid -> 1
            jnp.zeros((2 * Dhp,), jnp.float32),      # g, o
        ]).astype(XU.dtype)
        tail = jnp.broadcast_to(tail_row, (Tp - T, Bp, 4 * Dhp))
        XU = jnp.concatenate([XU, tail], axis=0)

    h0_p = jnp.pad(h0, ((0, Bp - B), (0, Dhp - Dh)))
    c0_p = jnp.pad(c0, ((0, Bp - B), (0, Dhp - Dh)))

    out_dtype = X.dtype
    c_dtype = c0.dtype
    out_isz = jnp.dtype(out_dtype).itemsize
    xu_isz = jnp.dtype(XU.dtype).itemsize
    st_isz = jnp.dtype(h0_p.dtype).itemsize
    c_isz = jnp.dtype(c_dtype).itemsize

    # VMEM budget: resident W^T + double-buffered XU / h chunks + state + scratch.
    vmem_est = (Dhp * 4 * Dhp * rdt.itemsize
                + 2 * Tt * Bb * 4 * Dhp * xu_isz
                + 2 * Tt * Bb * Dhp * out_isz
                + 4 * Bb * Dhp * st_isz
                + 2 * Bb * Dhp * c_isz
                + 2 * Bb * Dhp * 4)
    vmem_limit = int(min(max(int(vmem_est * 1.5) + (2 << 20), 32 << 20), 128 << 20))

    cost = pl.CostEstimate(
        flops=int(2 * Tp * Bp * Dhp * 4 * Dhp + 10 * Tp * Bp * Dhp),
        transcendentals=int(5 * Tp * Bp * Dhp),
        bytes_accessed=int(Tp * Bp * 4 * Dhp * xu_isz      # XU stream
                           + Tp * Bp * Dhp * out_isz        # h writeback
                           + Dhp * 4 * Dhp * rdt.itemsize   # W^T
                           + 2 * Bp * Dhp * st_isz          # h0, c0
                           + Bp * Dhp * c_isz))             # cT

    kernel = functools.partial(_lstm_kernel, Tt=Tt, Dh=Dhp, unroll=unroll)

    grid_spec = pltpu.PrefetchScalarGridSpec(
        num_scalar_prefetch=0,
        grid=(n_bblocks, n_chunks),                           # (parallel, arbitrary)
        in_specs=[
            pl.BlockSpec((Tt, Bb, 4 * Dhp), lambda b, t: (t, b, 0)),  # XU chunk (pipelined)
            pl.BlockSpec(memory_space=pltpu.MemorySpace.VMEM),        # W^T (single resident copy)
            pl.BlockSpec((Bb, Dhp), lambda b, t: (b, 0)),             # h0 block
            pl.BlockSpec((Bb, Dhp), lambda b, t: (b, 0)),             # c0 block
        ],
        out_specs=[
            pl.BlockSpec((Tt, Bb, Dhp), lambda b, t: (t, b, 0)),      # h chunk (lane-dense)
            pl.BlockSpec((Bb, Dhp), lambda b, t: (b, 0)),             # final cell state
        ],
        scratch_shapes=[
            pltpu.VMEM((Bb, Dhp), jnp.float32),                       # h carry (f32)
            pltpu.VMEM((Bb, Dhp), jnp.float32),                       # c carry (f32)
        ],
    )

    h_all_p, cT_p = pl.pallas_call(
        kernel,
        out_shape=(jax.ShapeDtypeStruct((Tp, Bp, Dhp), out_dtype),
                   jax.ShapeDtypeStruct((Bp, Dhp), c_dtype)),
        grid_spec=grid_spec,
        compiler_params=pltpu.CompilerParams(
            dimension_semantics=("parallel", "arbitrary"),   # batch blocks parallel (v7x), time sequential
            vmem_limit_bytes=vmem_limit),
        cost_estimate=cost,
    )(XU, W_T, h0_p, c0_p)

    return h_all_p[:T, :B, :Dh], cT_p[:B, :Dh]


def _reference_lstm(X, U, W, h0, c0):
    Dh = W.shape[1]

    def step(carry, x_t):
        h, c = carry
        gates = x_t @ U + h @ W.T
        i = jax.nn.sigmoid(gates[:, 0 * Dh:1 * Dh])
        f = jax.nn.sigmoid(gates[:, 1 * Dh:2 * Dh])
        g = jnp.tanh(gates[:, 2 * Dh:3 * Dh])
        o = jax.nn.sigmoid(gates[:, 3 * Dh:4 * Dh])
        c_new = f * c + i * g
        h_new = o * jnp.tanh(c_new)
        return (h_new, c_new), h_new

    (hT, cT), h_all = lax.scan(step, (h0, c0), X)
    return h_all, cT


if __name__ == "__main__":
    key = jax.random.PRNGKey(0)

    def make_case(k, T, B, Di, Dh):
        kx, kh, kc, ku, kw = jax.random.split(k, 5)
        stdv = 1.0 / math.sqrt(Dh)   # mirrors reset_parameters(): uniform(-stdv, stdv)
        U = jax.random.uniform(ku, (Di, 4 * Dh), jnp.float32, -stdv, stdv)
        W = jax.random.uniform(kw, (4 * Dh, Dh), jnp.float32, -stdv, stdv)
        X = jax.random.normal(kx, (T, B, Di), jnp.float32)
        h0 = jax.random.normal(kh, (B, Dh), jnp.float32)
        c0 = jax.random.normal(kc, (B, Dh), jnp.float32)
        return X, U, W, h0, c0

    k1, k2 = jax.random.split(key)

    # Case 1: small shapes consistent with the module: T=8, B=4, Di=16, Dh=32.
    X, U, W, h0, c0 = make_case(k1, T=8, B=4, Di=16, Dh=32)
    h_ref, c_ref = _reference_lstm(X, U, W, h0, c0)

    # Exact-semantics path (f32 recurrent matmul) -> tight tolerance.
    h_f32, c_f32 = cache_lstm_forward(X, U, W, h0, c0, recurrent_dtype="float32")
    jax.block_until_ready((h_f32, c_f32))
    assert jnp.allclose(h_f32, h_ref, atol=2e-5, rtol=2e-5)
    assert jnp.allclose(c_f32, c_ref, atol=2e-5, rtol=2e-5)

    # Default optimized path (bf16 recurrent matmul, f32 accumulation/state).
    h_bf, c_bf = cache_lstm_forward(X, U, W, h0, c0)
    jax.block_until_ready((h_bf, c_bf))
    assert jnp.allclose(h_bf, h_ref, atol=5e-2, rtol=5e-2)
    assert jnp.allclose(c_bf, c_ref, atol=5e-2, rtol=5e-2)

    # Case 2: exercises time-tail padding (T=13 with time_block=8) and the
    # batch-parallel grid axis (batch_blocks=2 -> v7x megacore path).
    X2, U2, W2, h02, c02 = make_case(k2, T=13, B=16, Di=24, Dh=48)
    h_ref2, c_ref2 = _reference_lstm(X2, U2, W2, h02, c02)
    h2, c2 = cache_lstm_forward(X2, U2, W2, h02, c02, time_block=8, batch_blocks=2)
    jax.block_until_ready((h2, c2))
    assert jnp.allclose(h2, h_ref2, atol=5e-2, rtol=5e-2)
    assert jnp.allclose(c2, c_ref2, atol=5e-2, rtol=5e-2)

    print("KERNEL_OK")
</pallas_src>

<mosaic_0001>
module attributes {stable_mosaic.version = 11 : i64} {
  func.func @_lstm_kernel(%arg0: i32, %arg1: i32, %arg2: memref<8x8x512xf32, #tpu.memory_space<vmem>>, %arg3: memref<128x512xf32, #tpu.memory_space<vmem>>, %arg4: memref<8x128xf32, #tpu.memory_space<vmem>>, %arg5: memref<8x128xf32, #tpu.memory_space<vmem>>, %arg6: memref<8x8x128xf32, #tpu.memory_space<vmem>>, %arg7: memref<8x128xf32, #tpu.memory_space<vmem>>, %arg8: memref<8x128xf32, #tpu.memory_space<vmem>>, %arg9: memref<8x128xf32, #tpu.memory_space<vmem>>) attributes {dimension_semantics = [#tpu.dimension_semantics<parallel>, #tpu.dimension_semantics<arbitrary>], iteration_bounds = array<i64: 1, 1>, scalar_prefetch = 0 : i64, scratch_operands = 2 : i64, tpu.core_type = #tpu.core_type<tc>, window_params = [{transform_indices = @transform_0, window_bounds = array<i64: 8, 8, 512>}, {pipeline_mode = #tpu.pipeline_mode<synchronous>, transform_indices = @transform_1, window_bounds = array<i64: 128, 512>}, {transform_indices = @transform_2, window_bounds = array<i64: 8, 128>}, {transform_indices = @transform_3, window_bounds = array<i64: 8, 128>}, {transform_indices = @transform_4, window_bounds = array<i64: 8, 8, 128>}, {transform_indices = @transform_5, window_bounds = array<i64: 8, 128>}]} {
    %c0_i32 = arith.constant 0 : i32
    %0 = arith.cmpi eq, %arg1, %c0_i32 : i32
    %1 = arith.extui %0 : i1 to i32
    %c0_i32_0 = arith.constant 0 : i32
    %2 = arith.cmpi ne, %1, %c0_i32_0 : i32
    scf.if %2 {
      %c0_90 = arith.constant 0 : index
      %c0_91 = arith.constant 0 : index
      %290 = vector.load %arg4[%c0_90, %c0_91] : memref<8x128xf32, #tpu.memory_space<vmem>>, vector<8x128xf32>
      %c0_92 = arith.constant 0 : index
      %c0_93 = arith.constant 0 : index
      %291 = vector.load %arg8[%c0_92, %c0_93] : memref<8x128xf32, #tpu.memory_space<vmem>>, vector<8x128xf32>
      tpu.vector_store %arg8[%c0_92, %c0_93], %290 {strides = array<i32>} : memref<8x128xf32, #tpu.memory_space<vmem>>, vector<8x128xf32>,
      %c0_94 = arith.constant 0 : index
      %c0_95 = arith.constant 0 : index
      %292 = vector.load %arg5[%c0_94, %c0_95] : memref<8x128xf32, #tpu.memory_space<vmem>>, vector<8x128xf32>
      %c0_96 = arith.constant 0 : index
      %c0_97 = arith.constant 0 : index
      %293 = vector.load %arg9[%c0_96, %c0_97] : memref<8x128xf32, #tpu.memory_space<vmem>>, vector<8x128xf32>
      tpu.vector_store %arg9[%c0_96, %c0_97], %292 {strides = array<i32>} : memref<8x128xf32, #tpu.memory_space<vmem>>, vector<8x128xf32>,
    } else {
    }
    %c0 = arith.constant 0 : index
    %c0_1 = arith.constant 0 : index
    %3 = vector.load %arg8[%c0, %c0_1] : memref<8x128xf32, #tpu.memory_space<vmem>>, vector<8x128xf32>
    %c0_2 = arith.constant 0 : index
    %c0_3 = arith.constant 0 : index
    %4 = vector.load %arg9[%c0_2, %c0_3] : memref<8x128xf32, #tpu.memory_space<vmem>>, vector<8x128xf32>
    %c0_i32_4 = arith.constant 0 : i32
    %5 = arith.index_cast %c0_i32_4 : i32 to index
    %c0_5 = arith.constant 0 : index
    %c0_6 = arith.constant 0 : index
    %6 = vector.load %arg2[%5, %c0_5, %c0_6] : memref<8x8x512xf32, #tpu.memory_space<vmem>>, vector<1x8x512xf32>
    %7 = vector.shape_cast %6 : vector<1x8x512xf32> to vector<8x512xf32>
    %c0_7 = arith.constant 0 : index
    %c0_8 = arith.constant 0 : index
    %8 = vector.load %arg3[%c0_7, %c0_8] : memref<128x512xf32, #tpu.memory_space<vmem>>, vector<128x512xf32>
    %cst = arith.constant dense<0.000000e+00> : vector<8x512xf32>
    %9 = tpu.matmul %3, %8, %cst {dimension_numbers = #tpu.dot_dimension_numbers<[1], [0], [0], [1], [0, 0, 1, 1], [], []>} : vector<8x128xf32>, vector<128x512xf32>, vector<8x512xf32> -> vector<8x512xf32>
    %10 = arith.addf %7, %9 : vector<8x512xf32>
    %11 = vector.extract_strided_slice %10 {offsets = [0, 0], sizes = [8, 128], strides = [1, 1]} : vector<8x512xf32> to vector<8x128xf32>
    %12 = arith.negf %11 : vector<8x128xf32>
    %13 = math.exp %12 : vector<8x128xf32>
    %cst_9 = arith.constant 1.000000e+00 : f32
    %14 = vector.broadcast %cst_9 : f32 to vector<8x128xf32>
    %15 = arith.addf %14, %13 : vector<8x128xf32>
    %16 = arith.divf %14, %15 : vector<8x128xf32>
    %17 = vector.extract_strided_slice %10 {offsets = [0, 128], sizes = [8, 128], strides = [1, 1]} : vector<8x512xf32> to vector<8x128xf32>
    %18 = arith.negf %17 : vector<8x128xf32>
    %19 = math.exp %18 : vector<8x128xf32>
    %cst_10 = arith.constant 1.000000e+00 : f32
    %20 = vector.broadcast %cst_10 : f32 to vector<8x128xf32>
    %21 = arith.addf %20, %19 : vector<8x128xf32>
    %22 = arith.divf %20, %21 : vector<8x128xf32>
    %23 = vector.extract_strided_slice %10 {offsets = [0, 256], sizes = [8, 128], strides = [1, 1]} : vector<8x512xf32> to vector<8x128xf32>
    %24 = math.tanh %23 : vector<8x128xf32>
    %25 = vector.extract_strided_slice %10 {offsets = [0, 384], sizes = [8, 128], strides = [1, 1]} : vector<8x512xf32> to vector<8x128xf32>
    %26 = arith.negf %25 : vector<8x128xf32>
    %27 = math.exp %26 : vector<8x128xf32>
    %cst_11 = arith.constant 1.000000e+00 : f32
    %28 = vector.broadcast %cst_11 : f32 to vector<8x128xf32>
    %29 = arith.addf %28, %27 : vector<8x128xf32>
    %30 = arith.divf %28, %29 : vector<8x128xf32>
    %31 = arith.mulf %22, %4 : vector<8x128xf32>
    %32 = arith.mulf %16, %24 : vector<8x128xf32>
    %33 = arith.addf %31, %32 : vector<8x128xf32>
    %34 = math.tanh %33 : vector<8x128xf32>
    %35 = arith.mulf %30, %34 : vector<8x128xf32>
    %36 = arith.index_cast %c0_i32_4 : i32 to index
    %c0_12 = arith.constant 0 : index
    %c0_13 = arith.constant 0 : index
    %37 = vector.load %arg6[%36, %c0_12, %c0_13] : memref<8x8x128xf32, #tpu.memory_space<vmem>>, vector<1x8x128xf32>
    %38 = vector.shape_cast %37 : vector<1x8x128xf32> to vector<8x128xf32>
    %39 = vector.shape_cast %35 : vector<8x128xf32> to vector<1x8x128xf32>
    tpu.vector_store %arg6[%36, %c0_12, %c0_13], %39 {strides = array<i32>} : memref<8x8x128xf32, #tpu.memory_space<vmem>>, vector<1x8x128xf32>,
    %c1_i32 = arith.constant 1 : i32
    %40 = arith.index_cast %c1_i32 : i32 to index
    %c0_14 = arith.constant 0 : index
    %c0_15 = arith.constant 0 : index
    %41 = vector.load %arg2[%40, %c0_14, %c0_15] : memref<8x8x512xf32, #tpu.memory_space<vmem>>, vector<1x8x512xf32>
    %42 = vector.shape_cast %41 : vector<1x8x512xf32> to vector<8x512xf32>
    %c0_16 = arith.constant 0 : index
    %c0_17 = arith.constant 0 : index
    %43 = vector.load %arg3[%c0_16, %c0_17] : memref<128x512xf32, #tpu.memory_space<vmem>>, vector<128x512xf32>
    %cst_18 = arith.constant dense<0.000000e+00> : vector<8x512xf32>
    %44 = tpu.matmul %35, %43, %cst_18 {dimension_numbers = #tpu.dot_dimension_numbers<[1], [0], [0], [1], [0, 0, 1, 1], [], []>} : vector<8x128xf32>, vector<128x512xf32>, vector<8x512xf32> -> vector<8x512xf32>
    %45 = arith.addf %42, %44 : vector<8x512xf32>
    %46 = vector.extract_strided_slice %45 {offsets = [0, 0], sizes = [8, 128], strides = [1, 1]} : vector<8x512xf32> to vector<8x128xf32>
    %47 = arith.negf %46 : vector<8x128xf32>
    %48 = math.exp %47 : vector<8x128xf32>
    %cst_19 = arith.constant 1.000000e+00 : f32
    %49 = vector.broadcast %cst_19 : f32 to vector<8x128xf32>
    %50 = arith.addf %49, %48 : vector<8x128xf32>
    %51 = arith.divf %49, %50 : vector<8x128xf32>
    %52 = vector.extract_strided_slice %45 {offsets = [0, 128], sizes = [8, 128], strides = [1, 1]} : vector<8x512xf32> to vector<8x128xf32>
    %53 = arith.negf %52 : vector<8x128xf32>
    %54 = math.exp %53 : vector<8x128xf32>
    %cst_20 = arith.constant 1.000000e+00 : f32
    %55 = vector.broadcast %cst_20 : f32 to vector<8x128xf32>
    %56 = arith.addf %55, %54 : vector<8x128xf32>
    %57 = arith.divf %55, %56 : vector<8x128xf32>
    %58 = vector.extract_strided_slice %45 {offsets = [0, 256], sizes = [8, 128], strides = [1, 1]} : vector<8x512xf32> to vector<8x128xf32>
    %59 = math.tanh %58 : vector<8x128xf32>
    %60 = vector.extract_strided_slice %45 {offsets = [0, 384], sizes = [8, 128], strides = [1, 1]} : vector<8x512xf32> to vector<8x128xf32>
    %61 = arith.negf %60 : vector<8x128xf32>
    %62 = math.exp %61 : vector<8x128xf32>
    %cst_21 = arith.constant 1.000000e+00 : f32
    %63 = vector.broadcast %cst_21 : f32 to vector<8x128xf32>
    %64 = arith.addf %63, %62 : vector<8x128xf32>
    %65 = arith.divf %63, %64 : vector<8x128xf32>
    %66 = arith.mulf %57, %33 : vector<8x128xf32>
    %67 = arith.mulf %51, %59 : vector<8x128xf32>
    %68 = arith.addf %66, %67 : vector<8x128xf32>
    %69 = math.tanh %68 : vector<8x128xf32>
    %70 = arith.mulf %65, %69 : vector<8x128xf32>
    %71 = arith.index_cast %c1_i32 : i32 to index
    %c0_22 = arith.constant 0 : index
    %c0_23 = arith.constant 0 : index
    %72 = vector.load %arg6[%71, %c0_22, %c0_23] : memref<8x8x128xf32, #tpu.memory_space<vmem>>, vector<1x8x128xf32>
    %73 = vector.shape_cast %72 : vector<1x8x128xf32> to vector<8x128xf32>
    %74 = vector.shape_cast %70 : vector<8x128xf32> to vector<1x8x128xf32>
    tpu.vector_store %arg6[%71, %c0_22, %c0_23], %74 {strides = array<i32>} : memref<8x8x128xf32, #tpu.memory_space<vmem>>, vector<1x8x128xf32>,
    %c2_i32 = arith.constant 2 : i32
    %75 = arith.index_cast %c2_i32 : i32 to index
    %c0_24 = arith.constant 0 : index
    %c0_25 = arith.constant 0 : index
    %76 = vector.load %arg2[%75, %c0_24, %c0_25] : memref<8x8x512xf32, #tpu.memory_space<vmem>>, vector<1x8x512xf32>
    %77 = vector.shape_cast %76 : vector<1x8x512xf32> to vector<8x512xf32>
    %c0_26 = arith.constant 0 : index
    %c0_27 = arith.constant 0 : index
    %78 = vector.load %arg3[%c0_26, %c0_27] : memref<128x512xf32, #tpu.memory_space<vmem>>, vector<128x512xf32>
    %cst_28 = arith.constant dense<0.000000e+00> : vector<8x512xf32>
    %79 = tpu.matmul %70, %78, %cst_28 {dimension_numbers = #tpu.dot_dimension_numbers<[1], [0], [0], [1], [0, 0, 1, 1], [], []>} : vector<8x128xf32>, vector<128x512xf32>, vector<8x512xf32> -> vector<8x512xf32>
    %80 = arith.addf %77, %79 : vector<8x512xf32>
    %81 = vector.extract_strided_slice %80 {offsets = [0, 0], sizes = [8, 128], strides = [1, 1]} : vector<8x512xf32> to vector<8x128xf32>
    %82 = arith.negf %81 : vector<8x128xf32>
    %83 = math.exp %82 : vector<8x128xf32>
    %cst_29 = arith.constant 1.000000e+00 : f32
    %84 = vector.broadcast %cst_29 : f32 to vector<8x128xf32>
    %85 = arith.addf %84, %83 : vector<8x128xf32>
    %86 = arith.divf %84, %85 : vector<8x128xf32>
    %87 = vector.extract_strided_slice %80 {offsets = [0, 128], sizes = [8, 128], strides = [1, 1]} : vector<8x512xf32> to vector<8x128xf32>
    %88 = arith.negf %87 : vector<8x128xf32>
    %89 = math.exp %88 : vector<8x128xf32>
    %cst_30 = arith.constant 1.000000e+00 : f32
    %90 = vector.broadcast %cst_30 : f32 to vector<8x128xf32>
    %91 = arith.addf %90, %89 : vector<8x128xf32>
    %92 = arith.divf %90, %91 : vector<8x128xf32>
    %93 = vector.extract_strided_slice %80 {offsets = [0, 256], sizes = [8, 128], strides = [1, 1]} : vector<8x512xf32> to vector<8x128xf32>
    %94 = math.tanh %93 : vector<8x128xf32>
    %95 = vector.extract_strided_slice %80 {offsets = [0, 384], sizes = [8, 128], strides = [1, 1]} : vector<8x512xf32> to vector<8x128xf32>
    %96 = arith.negf %95 : vector<8x128xf32>
    %97 = math.exp %96 : vector<8x128xf32>
    %cst_31 = arith.constant 1.000000e+00 : f32
    %98 = vector.broadcast %cst_31 : f32 to vector<8x128xf32>
    %99 = arith.addf %98, %97 : vector<8x128xf32>
    %100 = arith.divf %98, %99 : vector<8x128xf32>
    %101 = arith.mulf %92, %68 : vector<8x128xf32>
    %102 = arith.mulf %86, %94 : vector<8x128xf32>
    %103 = arith.addf %101, %102 : vector<8x128xf32>
    %104 = math.tanh %103 : vector<8x128xf32>
    %105 = arith.mulf %100, %104 : vector<8x128xf32>
    %106 = arith.index_cast %c2_i32 : i32 to index
    %c0_32 = arith.constant 0 : index
    %c0_33 = arith.constant 0 : index
    %107 = vector.load %arg6[%106, %c0_32, %c0_33] : memref<8x8x128xf32, #tpu.memory_space<vmem>>, vector<1x8x128xf32>
    %108 = vector.shape_cast %107 : vector<1x8x128xf32> to vector<8x128xf32>
    %109 = vector.shape_cast %105 : vector<8x128xf32> to vector<1x8x128xf32>
    tpu.vector_store %arg6[%106, %c0_32, %c0_33], %109 {strides = array<i32>} : memref<8x8x128xf32, #tpu.memory_space<vmem>>, vector<1x8x128xf32>,
    %c3_i32 = arith.constant 3 : i32
    %110 = arith.index_cast %c3_i32 : i32 to index
    %c0_34 = arith.constant 0 : index
    %c0_35 = arith.constant 0 : index
    %111 = vector.load %arg2[%110, %c0_34, %c0_35] : memref<8x8x512xf32, #tpu.memory_space<vmem>>, vector<1x8x512xf32>
    %112 = vector.shape_cast %111 : vector<1x8x512xf32> to vector<8x512xf32>
    %c0_36 = arith.constant 0 : index
    %c0_37 = arith.constant 0 : index
    %113 = vector.load %arg3[%c0_36, %c0_37] : memref<128x512xf32, #tpu.memory_space<vmem>>, vector<128x512xf32>
    %cst_38 = arith.constant dense<0.000000e+00> : vector<8x512xf32>
    %114 = tpu.matmul %105, %113, %cst_38 {dimension_numbers = #tpu.dot_dimension_numbers<[1], [0], [0], [1], [0, 0, 1, 1], [], []>} : vector<8x128xf32>, vector<128x512xf32>, vector<8x512xf32> -> vector<8x512xf32>
    %115 = arith.addf %112, %114 : vector<8x512xf32>
    %116 = vector.extract_strided_slice %115 {offsets = [0, 0], sizes = [8, 128], strides = [1, 1]} : vector<8x512xf32> to vector<8x128xf32>
    %117 = arith.negf %116 : vector<8x128xf32>
    %118 = math.exp %117 : vector<8x128xf32>
    %cst_39 = arith.constant 1.000000e+00 : f32
    %119 = vector.broadcast %cst_39 : f32 to vector<8x128xf32>
    %120 = arith.addf %119, %118 : vector<8x128xf32>
    %121 = arith.divf %119, %120 : vector<8x128xf32>
    %122 = vector.extract_strided_slice %115 {offsets = [0, 128], sizes = [8, 128], strides = [1, 1]} : vector<8x512xf32> to vector<8x128xf32>
    %123 = arith.negf %122 : vector<8x128xf32>
    %124 = math.exp %123 : vector<8x128xf32>
    %cst_40 = arith.constant 1.000000e+00 : f32
    %125 = vector.broadcast %cst_40 : f32 to vector<8x128xf32>
    %126 = arith.addf %125, %124 : vector<8x128xf32>
    %127 = arith.divf %125, %126 : vector<8x128xf32>
    %128 = vector.extract_strided_slice %115 {offsets = [0, 256], sizes = [8, 128], strides = [1, 1]} : vector<8x512xf32> to vector<8x128xf32>
    %129 = math.tanh %128 : vector<8x128xf32>
    %130 = vector.extract_strided_slice %115 {offsets = [0, 384], sizes = [8, 128], strides = [1, 1]} : vector<8x512xf32> to vector<8x128xf32>
    %131 = arith.negf %130 : vector<8x128xf32>
    %132 = math.exp %131 : vector<8x128xf32>
    %cst_41 = arith.constant 1.000000e+00 : f32
    %133 = vector.broadcast %cst_41 : f32 to vector<8x128xf32>
    %134 = arith.addf %133, %132 : vector<8x128xf32>
    %135 = arith.divf %133, %134 : vector<8x128xf32>
    %136 = arith.mulf %127, %103 : vector<8x128xf32>
    %137 = arith.mulf %121, %129 : vector<8x128xf32>
    %138 = arith.addf %136, %137 : vector<8x128xf32>
    %139 = math.tanh %138 : vector<8x128xf32>
    %140 = arith.mulf %135, %139 : vector<8x128xf32>
    %141 = arith.index_cast %c3_i32 : i32 to index
    %c0_42 = arith.constant 0 : index
    %c0_43 = arith.constant 0 : index
    %142 = vector.load %arg6[%141, %c0_42, %c0_43] : memref<8x8x128xf32, #tpu.memory_space<vmem>>, vector<1x8x128xf32>
    %143 = vector.shape_cast %142 : vector<1x8x128xf32> to vector<8x128xf32>
    %144 = vector.shape_cast %140 : vector<8x128xf32> to vector<1x8x128xf32>
    tpu.vector_store %arg6[%141, %c0_42, %c0_43], %144 {strides = array<i32>} : memref<8x8x128xf32, #tpu.memory_space<vmem>>, vector<1x8x128xf32>,
    %c4_i32 = arith.constant 4 : i32
    %145 = arith.index_cast %c4_i32 : i32 to index
    %c0_44 = arith.constant 0 : index
    %c0_45 = arith.constant 0 : index
    %146 = vector.load %arg2[%145, %c0_44, %c0_45] : memref<8x8x512xf32, #tpu.memory_space<vmem>>, vector<1x8x512xf32>
    %147 = vector.shape_cast %146 : vector<1x8x512xf32> to vector<8x512xf32>
    %c0_46 = arith.constant 0 : index
    %c0_47 = arith.constant 0 : index
    %148 = vector.load %arg3[%c0_46, %c0_47] : memref<128x512xf32, #tpu.memory_space<vmem>>, vector<128x512xf32>
    %cst_48 = arith.constant dense<0.000000e+00> : vector<8x512xf32>
    %149 = tpu.matmul %140, %148, %cst_48 {dimension_numbers = #tpu.dot_dimension_numbers<[1], [0], [0], [1], [0, 0, 1, 1], [], []>} : vector<8x128xf32>, vector<128x512xf32>, vector<8x512xf32> -> vector<8x512xf32>
    %150 = arith.addf %147, %149 : vector<8x512xf32>
    %151 = vector.extract_strided_slice %150 {offsets = [0, 0], sizes = [8, 128], strides = [1, 1]} : vector<8x512xf32> to vector<8x128xf32>
    %152 = arith.negf %151 : vector<8x128xf32>
    %153 = math.exp %152 : vector<8x128xf32>
    %cst_49 = arith.constant 1.000000e+00 : f32
    %154 = vector.broadcast %cst_49 : f32 to vector<8x128xf32>
    %155 = arith.addf %154, %153 : vector<8x128xf32>
    %156 = arith.divf %154, %155 : vector<8x128xf32>
    %157 = vector.extract_strided_slice %150 {offsets = [0, 128], sizes = [8, 128], strides = [1, 1]} : vector<8x512xf32> to vector<8x128xf32>
    %158 = arith.negf %157 : vector<8x128xf32>
    %159 = math.exp %158 : vector<8x128xf32>
    %cst_50 = arith.constant 1.000000e+00 : f32
    %160 = vector.broadcast %cst_50 : f32 to vector<8x128xf32>
    %161 = arith.addf %160, %159 : vector<8x128xf32>
    %162 = arith.divf %160, %161 : vector<8x128xf32>
    %163 = vector.extract_strided_slice %150 {offsets = [0, 256], sizes = [8, 128], strides = [1, 1]} : vector<8x512xf32> to vector<8x128xf32>
    %164 = math.tanh %163 : vector<8x128xf32>
    %165 = vector.extract_strided_slice %150 {offsets = [0, 384], sizes = [8, 128], strides = [1, 1]} : vector<8x512xf32> to vector<8x128xf32>
    %166 = arith.negf %165 : vector<8x128xf32>
    %167 = math.exp %166 : vector<8x128xf32>
    %cst_51 = arith.constant 1.000000e+00 : f32
    %168 = vector.broadcast %cst_51 : f32 to vector<8x128xf32>
    %169 = arith.addf %168, %167 : vector<8x128xf32>
    %170 = arith.divf %168, %169 : vector<8x128xf32>
    %171 = arith.mulf %162, %138 : vector<8x128xf32>
    %172 = arith.mulf %156, %164 : vector<8x128xf32>
    %173 = arith.addf %171, %172 : vector<8x128xf32>
    %174 = math.tanh %173 : vector<8x128xf32>
    %175 = arith.mulf %170, %174 : vector<8x128xf32>
    %176 = arith.index_cast %c4_i32 : i32 to index
    %c0_52 = arith.constant 0 : index
    %c0_53 = arith.constant 0 : index
    %177 = vector.load %arg6[%176, %c0_52, %c0_53] : memref<8x8x128xf32, #tpu.memory_space<vmem>>, vector<1x8x128xf32>
    %178 = vector.shape_cast %177 : vector<1x8x128xf32> to vector<8x128xf32>
    %179 = vector.shape_cast %175 : vector<8x128xf32> to vector<1x8x128xf32>
    tpu.vector_store %arg6[%176, %c0_52, %c0_53], %179 {strides = array<i32>} : memref<8x8x128xf32, #tpu.memory_space<vmem>>, vector<1x8x128xf32>,
    %c5_i32 = arith.constant 5 : i32
    %180 = arith.index_cast %c5_i32 : i32 to index
    %c0_54 = arith.constant 0 : index
    %c0_55 = arith.constant 0 : index
    %181 = vector.load %arg2[%180, %c0_54, %c0_55] : memref<8x8x512xf32, #tpu.memory_space<vmem>>, vector<1x8x512xf32>
    %182 = vector.shape_cast %181 : vector<1x8x512xf32> to vector<8x512xf32>
    %c0_56 = arith.constant 0 : index
    %c0_57 = arith.constant 0 : index
    %183 = vector.load %arg3[%c0_56, %c0_57] : memref<128x512xf32, #tpu.memory_space<vmem>>, vector<128x512xf32>
    %cst_58 = arith.constant dense<0.000000e+00> : vector<8x512xf32>
    %184 = tpu.matmul %175, %183, %cst_58 {dimension_numbers = #tpu.dot_dimension_numbers<[1], [0], [0], [1], [0, 0, 1, 1], [], []>} : vector<8x128xf32>, vector<128x512xf32>, vector<8x512xf32> -> vector<8x512xf32>
    %185 = arith.addf %182, %184 : vector<8x512xf32>
    %186 = vector.extract_strided_slice %185 {offsets = [0, 0], sizes = [8, 128], strides = [1, 1]} : vector<8x512xf32> to vector<8x128xf32>
    %187 = arith.negf %186 : vector<8x128xf32>
    %188 = math.exp %187 : vector<8x128xf32>
    %cst_59 = arith.constant 1.000000e+00 : f32
    %189 = vector.broadcast %cst_59 : f32 to vector<8x128xf32>
    %190 = arith.addf %189, %188 : vector<8x128xf32>
    %191 = arith.divf %189, %190 : vector<8x128xf32>
    %192 = vector.extract_strided_slice %185 {offsets = [0, 128], sizes = [8, 128], strides = [1, 1]} : vector<8x512xf32> to vector<8x128xf32>
    %193 = arith.negf %192 : vector<8x128xf32>
    %194 = math.exp %193 : vector<8x128xf32>
    %cst_60 = arith.constant 1.000000e+00 : f32
    %195 = vector.broadcast %cst_60 : f32 to vector<8x128xf32>
    %196 = arith.addf %195, %194 : vector<8x128xf32>
    %197 = arith.divf %195, %196 : vector<8x128xf32>
    %198 = vector.extract_strided_slice %185 {offsets = [0, 256], sizes = [8, 128], strides = [1, 1]} : vector<8x512xf32> to vector<8x128xf32>
    %199 = math.tanh %198 : vector<8x128xf32>
    %200 = vector.extract_strided_slice %185 {offsets = [0, 384], sizes = [8, 128], strides = [1, 1]} : vector<8x512xf32> to vector<8x128xf32>
    %201 = arith.negf %200 : vector<8x128xf32>
    %202 = math.exp %201 : vector<8x128xf32>
    %cst_61 = arith.constant 1.000000e+00 : f32
    %203 = vector.broadcast %cst_61 : f32 to vector<8x128xf32>
    %204 = arith.addf %203, %202 : vector<8x128xf32>
    %205 = arith.divf %203, %204 : vector<8x128xf32>
    %206 = arith.mulf %197, %173 : vector<8x128xf32>
    %207 = arith.mulf %191, %199 : vector<8x128xf32>
    %208 = arith.addf %206, %207 : vector<8x128xf32>
    %209 = math.tanh %208 : vector<8x128xf32>
    %210 = arith.mulf %205, %209 : vector<8x128xf32>
    %211 = arith.index_cast %c5_i32 : i32 to index
    %c0_62 = arith.constant 0 : index
    %c0_63 = arith.constant 0 : index
    %212 = vector.load %arg6[%211, %c0_62, %c0_63] : memref<8x8x128xf32, #tpu.memory_space<vmem>>, vector<1x8x128xf32>
    %213 = vector.shape_cast %212 : vector<1x8x128xf32> to vector<8x128xf32>
    %214 = vector.shape_cast %210 : vector<8x128xf32> to vector<1x8x128xf32>
    tpu.vector_store %arg6[%211, %c0_62, %c0_63], %214 {strides = array<i32>} : memref<8x8x128xf32, #tpu.memory_space<vmem>>, vector<1x8x128xf32>,
    %c6_i32 = arith.constant 6 : i32
    %215 = arith.index_cast %c6_i32 : i32 to index
    %c0_64 = arith.constant 0 : index
    %c0_65 = arith.constant 0 : index
    %216 = vector.load %arg2[%215, %c0_64, %c0_65] : memref<8x8x512xf32, #tpu.memory_space<vmem>>, vector<1x8x512xf32>
    %217 = vector.shape_cast %216 : vector<1x8x512xf32> to vector<8x512xf32>
    %c0_66 = arith.constant 0 : index
    %c0_67 = arith.constant 0 : index
    %218 = vector.load %arg3[%c0_66, %c0_67] : memref<128x512xf32, #tpu.memory_space<vmem>>, vector<128x512xf32>
    %cst_68 = arith.constant dense<0.000000e+00> : vector<8x512xf32>
    %219 = tpu.matmul %210, %218, %cst_68 {dimension_numbers = #tpu.dot_dimension_numbers<[1], [0], [0], [1], [0, 0, 1, 1], [], []>} : vector<8x128xf32>, vector<128x512xf32>, vector<8x512xf32> -> vector<8x512xf32>
    %220 = arith.addf %217, %219 : vector<8x512xf32>
    %221 = vector.extract_strided_slice %220 {offsets = [0, 0], sizes = [8, 128], strides = [1, 1]} : vector<8x512xf32> to vector<8x128xf32>
    %222 = arith.negf %221 : vector<8x128xf32>
    %223 = math.exp %222 : vector<8x128xf32>
    %cst_69 = arith.constant 1.000000e+00 : f32
    %224 = vector.broadcast %cst_69 : f32 to vector<8x128xf32>
    %225 = arith.addf %224, %223 : vector<8x128xf32>
    %226 = arith.divf %224, %225 : vector<8x128xf32>
    %227 = vector.extract_strided_slice %220 {offsets = [0, 128], sizes = [8, 128], strides = [1, 1]} : vector<8x512xf32> to vector<8x128xf32>
    %228 = arith.negf %227 : vector<8x128xf32>
    %229 = math.exp %228 : vector<8x128xf32>
    %cst_70 = arith.constant 1.000000e+00 : f32
    %230 = vector.broadcast %cst_70 : f32 to vector<8x128xf32>
    %231 = arith.addf %230, %229 : vector<8x128xf32>
    %232 = arith.divf %230, %231 : vector<8x128xf32>
    %233 = vector.extract_strided_slice %220 {offsets = [0, 256], sizes = [8, 128], strides = [1, 1]} : vector<8x512xf32> to vector<8x128xf32>
    %234 = math.tanh %233 : vector<8x128xf32>
    %235 = vector.extract_strided_slice %220 {offsets = [0, 384], sizes = [8, 128], strides = [1, 1]} : vector<8x512xf32> to vector<8x128xf32>
    %236 = arith.negf %235 : vector<8x128xf32>
    %237 = math.exp %236 : vector<8x128xf32>
    %cst_71 = arith.constant 1.000000e+00 : f32
    %238 = vector.broadcast %cst_71 : f32 to vector<8x128xf32>
    %239 = arith.addf %238, %237 : vector<8x128xf32>
    %240 = arith.divf %238, %239 : vector<8x128xf32>
    %241 = arith.mulf %232, %208 : vector<8x128xf32>
    %242 = arith.mulf %226, %234 : vector<8x128xf32>
    %243 = arith.addf %241, %242 : vector<8x128xf32>
    %244 = math.tanh %243 : vector<8x128xf32>
    %245 = arith.mulf %240, %244 : vector<8x128xf32>
    %246 = arith.index_cast %c6_i32 : i32 to index
    %c0_72 = arith.constant 0 : index
    %c0_73 = arith.constant 0 : index
    %247 = vector.load %arg6[%246, %c0_72, %c0_73] : memref<8x8x128xf32, #tpu.memory_space<vmem>>, vector<1x8x128xf32>
    %248 = vector.shape_cast %247 : vector<1x8x128xf32> to vector<8x128xf32>
    %249 = vector.shape_cast %245 : vector<8x128xf32> to vector<1x8x128xf32>
    tpu.vector_store %arg6[%246, %c0_72, %c0_73], %249 {strides = array<i32>} : memref<8x8x128xf32, #tpu.memory_space<vmem>>, vector<1x8x128xf32>,
    %c7_i32 = arith.constant 7 : i32
    %250 = arith.index_cast %c7_i32 : i32 to index
    %c0_74 = arith.constant 0 : index
    %c0_75 = arith.constant 0 : index
    %251 = vector.load %arg2[%250, %c0_74, %c0_75] : memref<8x8x512xf32, #tpu.memory_space<vmem>>, vector<1x8x512xf32>
    %252 = vector.shape_cast %251 : vector<1x8x512xf32> to vector<8x512xf32>
    %c0_76 = arith.constant 0 : index
    %c0_77 = arith.constant 0 : index
    %253 = vector.load %arg3[%c0_76, %c0_77] : memref<128x512xf32, #tpu.memory_space<vmem>>, vector<128x512xf32>
    %cst_78 = arith.constant dense<0.000000e+00> : vector<8x512xf32>
    %254 = tpu.matmul %245, %253, %cst_78 {dimension_numbers = #tpu.dot_dimension_numbers<[1], [0], [0], [1], [0, 0, 1, 1], [], []>} : vector<8x128xf32>, vector<128x512xf32>, vector<8x512xf32> -> vector<8x512xf32>
    %255 = arith.addf %252, %254 : vector<8x512xf32>
    %256 = vector.extract_strided_slice %255 {offsets = [0, 0], sizes = [8, 128], strides = [1, 1]} : vector<8x512xf32> to vector<8x128xf32>
    %257 = arith.negf %256 : vector<8x128xf32>
    %258 = math.exp %257 : vector<8x128xf32>
    %cst_79 = arith.constant 1.000000e+00 : f32
    %259 = vector.broadcast %cst_79 : f32 to vector<8x128xf32>
    %260 = arith.addf %259, %258 : vector<8x128xf32>
    %261 = arith.divf %259, %260 : vector<8x128xf32>
    %262 = vector.extract_strided_slice %255 {offsets = [0, 128], sizes = [8, 128], strides = [1, 1]} : vector<8x512xf32> to vector<8x128xf32>
    %263 = arith.negf %262 : vector<8x128xf32>
    %264 = math.exp %263 : vector<8x128xf32>
    %cst_80 = arith.constant 1.000000e+00 : f32
    %265 = vector.broadcast %cst_80 : f32 to vector<8x128xf32>
    %266 = arith.addf %265, %264 : vector<8x128xf32>
    %267 = arith.divf %265, %266 : vector<8x128xf32>
    %268 = vector.extract_strided_slice %255 {offsets = [0, 256], sizes = [8, 128], strides = [1, 1]} : vector<8x512xf32> to vector<8x128xf32>
    %269 = math.tanh %268 : vector<8x128xf32>
    %270 = vector.extract_strided_slice %255 {offsets = [0, 384], sizes = [8, 128], strides = [1, 1]} : vector<8x512xf32> to vector<8x128xf32>
    %271 = arith.negf %270 : vector<8x128xf32>
    %272 = math.exp %271 : vector<8x128xf32>
    %cst_81 = arith.constant 1.000000e+00 : f32
    %273 = vector.broadcast %cst_81 : f32 to vector<8x128xf32>
    %274 = arith.addf %273, %272 : vector<8x128xf32>
    %275 = arith.divf %273, %274 : vector<8x128xf32>
    %276 = arith.mulf %267, %243 : vector<8x128xf32>
    %277 = arith.mulf %261, %269 : vector<8x128xf32>
    %278 = arith.addf %276, %277 : vector<8x128xf32>
    %279 = math.tanh %278 : vector<8x128xf32>
    %280 = arith.mulf %275, %279 : vector<8x128xf32>
    %281 = arith.index_cast %c7_i32 : i32 to index
    %c0_82 = arith.constant 0 : index
    %c0_83 = arith.constant 0 : index
    %282 = vector.load %arg6[%281, %c0_82, %c0_83] : memref<8x8x128xf32, #tpu.memory_space<vmem>>, vector<1x8x128xf32>
    %283 = vector.shape_cast %282 : vector<1x8x128xf32> to vector<8x128xf32>
    %284 = vector.shape_cast %280 : vector<8x128xf32> to vector<1x8x128xf32>
    tpu.vector_store %arg6[%281, %c0_82, %c0_83], %284 {strides = array<i32>} : memref<8x8x128xf32, #tpu.memory_space<vmem>>, vector<1x8x128xf32>,
    %c8_i32 = arith.constant 8 : i32
    %c0_84 = arith.constant 0 : index
    %c0_85 = arith.constant 0 : index
    %285 = vector.load %arg8[%c0_84, %c0_85] : memref<8x128xf32, #tpu.memory_space<vmem>>, vector<8x128xf32>
    tpu.vector_store %arg8[%c0_84, %c0_85], %280 {strides = array<i32>} : memref<8x128xf32, #tpu.memory_space<vmem>>, vector<8x128xf32>,
    %c0_86 = arith.constant 0 : index
    %c0_87 = arith.constant 0 : index
    %286 = vector.load %arg9[%c0_86, %c0_87] : memref<8x128xf32, #tpu.memory_space<vmem>>, vector<8x128xf32>
    tpu.vector_store %arg9[%c0_86, %c0_87], %278 {strides = array<i32>} : memref<8x128xf32, #tpu.memory_space<vmem>>, vector<8x128xf32>,
    %c0_i32_88 = arith.constant 0 : i32
    %287 = arith.cmpi eq, %arg1, %c0_i32_88 : i32
    %288 = arith.extui %287 : i1 to i32
    %c0_i32_89 = arith.constant 0 : i32
    %289 = arith.cmpi ne, %288, %c0_i32_89 : i32
    scf.if %289 {
      %c0_90 = arith.constant 0 : index
      %c0_91 = arith.constant 0 : index
      %290 = vector.load %arg7[%c0_90, %c0_91] : memref<8x128xf32, #tpu.memory_space<vmem>>, vector<8x128xf32>
      tpu.vector_store %arg7[%c0_90, %c0_91], %278 {strides = array<i32>} : memref<8x128xf32, #tpu.memory_space<vmem>>, vector<8x128xf32>,
    } else {
    }
    return
  }
  func.func @transform_0(%arg0: i32, %arg1: i32) -> (i32, i32, i32) {
    %c0_i32 = arith.constant 0 : i32
    %c0_i32_0 = arith.constant 0 : i32
    return %arg1, %arg0, %c0_i32 : i32, i32, i32
  }
  func.func @transform_1(%arg0: i32, %arg1: i32) -> (i32, i32) {
    %c0_i32 = arith.constant 0 : i32
    %c0_i32_0 = arith.constant 0 : i32
    %c0_i32_1 = arith.constant 0 : i32
    return %c0_i32, %c0_i32_0 : i32, i32
  }
  func.func @transform_2(%arg0: i32, %arg1: i32) -> (i32, i32) {
    %c0_i32 = arith.constant 0 : i32
    %c0_i32_0 = arith.constant 0 : i32
    return %arg0, %c0_i32 : i32, i32
  }
  func.func @transform_3(%arg0: i32, %arg1: i32) -> (i32, i32) {
    %c0_i32 = arith.constant 0 : i32
    %c0_i32_0 = arith.constant 0 : i32
    return %arg0, %c0_i32 : i32, i32
  }
  func.func @transform_4(%arg0: i32, %arg1: i32) -> (i32, i32, i32) {
    %c0_i32 = arith.constant 0 : i32
    %c0_i32_0 = arith.constant 0 : i32
    return %arg1, %arg0, %c0_i32 : i32, i32, i32
  }
  func.func @transform_5(%arg0: i32, %arg1: i32) -> (i32, i32) {
    %c0_i32 = arith.constant 0 : i32
    %c0_i32_0 = arith.constant 0 : i32
    return %arg0, %c0_i32 : i32, i32
  }
}

</mosaic_0001>

<bundles_post_ra>
// kernel: cache_lstm_forward.1
= control target key start
LH: loop header
LB: loop body
LE: loop exit
PB: predicated region body
PF: predicated region fallthrough
CT: control target
= control target key end

     0   :  { %v2669_v3 = vmov 0.0   ;;  %s3692_s1 = inlined_call_operand.vmem [shape: f32[128,512], index: 1, kind: input, shape index: {}]   ;;  %s3693_s2 = inlined_call_operand.vmem [shape: f32[8,128], index: 2, kind: input, shape index: {}]   ;;  %s3694_s0 = inlined_call_operand.vmem [shape: f32[8,8,512], index: 0, kind: input, shape index: {}]   ;;  %s3695_s3 = inlined_call_operand.vmem [shape: f32[8,128], index: 3, kind: input, shape index: {}]   ;;  %s3696_s4 = inlined_call_operand.vmem [shape: f32[8,8,128], index: 4, kind: output, shape index: {0}]   ;;  %s3697_s5 = inlined_call_operand.vmem [shape: f32[8,128], index: 5, kind: output, shape index: {1}]  }
   0x1   :  { %v34_v0 = vld [vmem:[%s3692_s1 + $0x8] sm:$0xff]  ;;  %v33_v2 = vld [vmem:[%s3692_s1] sm:$0xff]  ;;  %161 = vmatprep.mubr.f32.mxu0 %v2669_v3  ;;  %232 = vmatprep.mubr.f32.mxu1 %v2669_v3  ;;  %v36_v19 = vld [vmem:[%s3692_s1 + $0x18] sm:$0xff] }
   0x2   :  { %v38_v1 = vld [vmem:[%s3692_s1 + $0x28] sm:$0xff]  ;;  %v37_v5 = vld [vmem:[%s3692_s1 + $0x20] sm:$0xff]  ;;  %v40_v20 = vld [vmem:[%s3692_s1 + $0x38] sm:$0xff] }
   0x3   :  { %v2711_v4 = vpack.c.bf16 %v38_v1, %v34_v0  ;;  %v42_v6 = vld [vmem:[%s3692_s1 + $0x48] sm:$0xff]  ;;  %v2722_v8 = vpack.c.bf16 %v37_v5, %v33_v2  ;;  %v41_v10 = vld [vmem:[%s3692_s1 + $0x40] sm:$0xff]  ;;  %v2763_v22 = vpack.c.bf16 %v40_v20, %v36_v19  ;;  %v35_v23 = vld [vmem:[%s3692_s1 + $0x10] sm:$0xff] }
   0x4   :  { %v46_v7 = vld [vmem:[%s3692_s1 + $0x68] sm:$0xff]  ;;  %v45_v11 = vld [vmem:[%s3692_s1 + $0x60] sm:$0xff]  ;;  %v39_v24 = vld [vmem:[%s3692_s1 + $0x30] sm:$0xff] }
   0x5   :  { %v2724_v9 = vpack.c.bf16 %v46_v7, %v42_v6  ;;  %v50_v12 = vld [vmem:[%s3692_s1 + $0x88] sm:$0xff]  ;;  %2029 = vmatprep.subr.bf16.mxu0 %v2711_v4  ;;  %v2740_v14 = vpack.c.bf16 %v45_v11, %v41_v10  ;;  %v49_v15 = vld [vmem:[%s3692_s1 + $0x80] sm:$0xff]  ;;  %v2771_v25 = vpack.c.bf16 %v39_v24, %v35_v23  ;;  %2061 = vmatprep.subr.bf16.mxu1 %v2763_v22  ;;  %v44_v27 = vld [vmem:[%s3692_s1 + $0x58] sm:$0xff] }
   0x6   :  { %v54_v13 = vld [vmem:[%s3692_s1 + $0xa8] sm:$0xff]  ;;  %2031 = vmatpush1.bf16.msra.mxu0 %v2722_v8  ;;  %v53_v16 = vld [vmem:[%s3692_s1 + $0xa0] sm:$0xff]  ;;  %v48_v28 = vld [vmem:[%s3692_s1 + $0x78] sm:$0xff] }
   0x7   :  { %2033 = vmatprep.subr.bf16.mxu0 %v2724_v9  ;;  %v2749_v17 = vpack.c.bf16 %v54_v13, %v50_v12  ;;  %v58_v18 = vld [vmem:[%s3692_s1 + $0xc8] sm:$0xff]  ;;  %v2774_v26 = vpack.c.bf16 %v53_v16, %v49_v15  ;;  %v43_v29 = vld [vmem:[%s3692_s1 + $0x50] sm:$0xff]  ;;  %v57_v31 = vld [vmem:[%s3692_s1 + $0xc0] sm:$0xff]  ;;  %2063 = vmatpush1.bf16.msra.mxu1 %v2771_v25  ;;  %v2796_v33 = vpack.c.bf16 %v48_v28, %v44_v27 }
   0x8   :  { %v62_v21 = vld [vmem:[%s3692_s1 + $0xe8] sm:$0xff]  ;;  %v61_v32 = vld [vmem:[%s3692_s1 + $0xe0] sm:$0xff]  ;;  %v47_v34 = vld [vmem:[%s3692_s1 + $0x70] sm:$0xff] }
   0x9   :  { %v2787_v30 = vpack.c.bf16 %v62_v21, %v58_v18  ;;  %v66_v35 = vld [vmem:[%s3692_s1 + $0x108] sm:$0xff]  ;;  %v2807_v37 = vpack.c.bf16 %v47_v34, %v43_v29  ;;  %v52_v38 = vld [vmem:[%s3692_s1 + $0x98] sm:$0xff]  ;;  %2065 = vmatprep.subr.bf16.mxu1 %v2796_v33  ;;  %v51_v40 = vld [vmem:[%s3692_s1 + $0x90] sm:$0xff]  ;;  %v2823_v42 = vpack.c.bf16 %v61_v32, %v57_v31 }
   0xa   :  { %2035 = vmatpush1.bf16.msra.mxu0 %v2740_v14  ;;  %v70_v36 = vld [vmem:[%s3692_s1 + $0x128] sm:$0xff]  ;;  %v56_v39 = vld [vmem:[%s3692_s1 + $0xb8] sm:$0xff]  ;;  %v55_v41 = vld [vmem:[%s3692_s1 + $0xb0] sm:$0xff] }
   0xb   :  { %2037 = vmatprep.subr.bf16.mxu0 %v2749_v17  ;;  %v65_v43 = vld [vmem:[%s3692_s1 + $0x100] sm:$0xff]  ;;  %v2831_v45 = vpack.c.bf16 %v56_v39, %v52_v38  ;;  %v2834_v46 = vpack.c.bf16 %v70_v36, %v66_v35  ;;  %2067 = vmatpush1.bf16.msra.mxu1 %v2807_v37  ;;  %v74_v47 = vld [vmem:[%s3692_s1 + $0x148] sm:$0xff]  ;;  %v2840_v48 = vpack.c.bf16 %v55_v41, %v51_v40  ;;  %v60_v49 = vld [vmem:[%s3692_s1 + $0xd8] sm:$0xff] }
   0xc   :  { %v69_v44 = vld [vmem:[%s3692_s1 + $0x120] sm:$0xff]  ;;  %v64_v50 = vld [vmem:[%s3692_s1 + $0xf8] sm:$0xff]  ;;  %v78_v51 = vld [vmem:[%s3692_s1 + $0x168] sm:$0xff] }
   0xd   :  { %2069 = vmatprep.subr.bf16.mxu1 %v2831_v45  ;;  %v2852_v52 = vpack.c.bf16 %v64_v50, %v60_v49  ;;  %v59_v53 = vld [vmem:[%s3692_s1 + $0xd0] sm:$0xff]  ;;  %v2861_v55 = vpack.c.bf16 %v69_v44, %v65_v43  ;;  %v68_v56 = vld [vmem:[%s3692_s1 + $0x118] sm:$0xff]  ;;  %v2870_v58 = vpack.c.bf16 %v78_v51, %v74_v47  ;;  %v73_v59 = vld [vmem:[%s3692_s1 + $0x140] sm:$0xff] }
   0xe   :  { %2039 = vmatpush1.bf16.msra.mxu0 %v2774_v26  ;;  %v63_v54 = vld [vmem:[%s3692_s1 + $0xf0] sm:$0xff]  ;;  %v72_v57 = vld [vmem:[%s3692_s1 + $0x138] sm:$0xff]  ;;  %v77_v60 = vld [vmem:[%s3692_s1 + $0x160] sm:$0xff] }
   0xf   :  { %2041 = vmatprep.subr.bf16.mxu0 %v2787_v30  ;;  %2071 = vmatpush1.bf16.msra.mxu1 %v2840_v48  ;;  %v82_v61 = vld [vmem:[%s3692_s1 + $0x188] sm:$0xff]  ;;  %v2882_v62 = vpack.c.bf16 %v63_v54, %v59_v53  ;;  %v2888_v0 = vpack.c.bf16 %v72_v57, %v68_v56  ;;  %v67_v1 = vld [vmem:[%s3692_s1 + $0x110] sm:$0xff]  ;;  %v76_v5 = vld [vmem:[%s3692_s1 + $0x158] sm:$0xff]  ;;  %v2903_v7 = vpack.c.bf16 %v77_v60, %v73_v59 }
  0x10   :  { %v86_v63 = vld [vmem:[%s3692_s1 + $0x1a8] sm:$0xff]  ;;  %2073 = vmatprep.subr.bf16.mxu1 %v2852_v52  ;;  %v71_v2 = vld [vmem:[%s3692_s1 + $0x130] sm:$0xff]  ;;  %v80_v6 = vld [vmem:[%s3692_s1 + $0x178] sm:$0xff] }
  0x11   :  { %v2906_v10 = vpack.c.bf16 %v86_v63, %v82_v61  ;;  %v81_v11 = vld [vmem:[%s3692_s1 + $0x180] sm:$0xff]  ;;  %v90_v13 = vld [vmem:[%s3692_s1 + $0x1c8] sm:$0xff]  ;;  %v2918_v15 = vpack.c.bf16 %v71_v2, %v67_v1  ;;  %v2924_v18 = vpack.c.bf16 %v80_v6, %v76_v5  ;;  %v75_v19 = vld [vmem:[%s3692_s1 + $0x150] sm:$0xff] }
  0x12   :  { %2043 = vmatpush1.bf16.msra.mxu0 %v2823_v42  ;;  %v85_v12 = vld [vmem:[%s3692_s1 + $0x1a0] sm:$0xff]  ;;  %v94_v16 = vld [vmem:[%s3692_s1 + $0x1e8] sm:$0xff]  ;;  %v79_v20 = vld [vmem:[%s3692_s1 + $0x170] sm:$0xff] }
  0x13   :  { %2045 = vmatprep.subr.bf16.mxu0 %v2834_v46  ;;  %2075 = vmatpush1.bf16.msra.mxu1 %v2882_v62  ;;  %v84_v21 = vld [vmem:[%s3692_s1 + $0x198] sm:$0xff]  ;;  %v2939_v24 = vpack.c.bf16 %v85_v12, %v81_v11  ;;  %v2942_v27 = vpack.c.bf16 %v94_v16, %v90_v13  ;;  %v89_v28 = vld [vmem:[%s3692_s1 + $0x1c0] sm:$0xff]  ;;  %v2951_v31 = vpack.c.bf16 %v79_v20, %v75_v19  ;;  %v83_v34 = vld [vmem:[%s3692_s1 + $0x190] sm:$0xff] }
  0x14   :  { %2077 = vmatprep.subr.bf16.mxu1 %v2888_v0  ;;  %v88_v23 = vld [vmem:[%s3692_s1 + $0x1b8] sm:$0xff]  ;;  %v93_v29 = vld [vmem:[%s3692_s1 + $0x1e0] sm:$0xff]  ;;  %v87_v35 = vld [vmem:[%s3692_s1 + $0x1b0] sm:$0xff] }
  0x15   :  { %v2954_v32 = vpack.c.bf16 %v88_v23, %v84_v21  ;;  %v92_v36 = vld [vmem:[%s3692_s1 + $0x1d8] sm:$0xff]  ;;  %v2969_v39 = vpack.c.bf16 %v93_v29, %v89_v28  ;;  %v2973_v40 = vpack.c.bf16 %v87_v35, %v83_v34  ;;  %v91_v43 = vld [vmem:[%s3692_s1 + $0x1d0] sm:$0xff]  ;;  %v23_v47 = vld [vmem:[%s3693_s2] sm:$0xff] }
  0x16   :  { %2047 = vmatpush1.bf16.msra.mxu0 %v2861_v55  ;;  %v96_v38 = vld [vmem:[%s3692_s1 + $0x1f8] sm:$0xff]  ;;  %v95_v44 = vld [vmem:[%s3692_s1 + $0x1f0] sm:$0xff]  ;;  %v29_v50 = vld [vmem:[%s3694_s0] sm:$0xff] }
  0x17   :  { %2049 = vmatprep.subr.bf16.mxu0 %v2870_v58  ;;  %2079 = vmatpush1.bf16.msra.mxu1 %v2918_v15  ;;  %v2976_v41 = vpack.c.bf16 %v96_v38, %v92_v36  ;;  %v2989_v49 = vpack.c.bf16 %v95_v44, %v91_v43  ;;  %v30_v51 = vld [vmem:[%s3694_s0 + $0x8] sm:$0xff]  ;;  %v32_v61 = vld [vmem:[%s3694_s0 + $0x18] sm:$0xff]  ;;  %v31_v5 = vld [vmem:[%s3694_s0 + $0x10] sm:$0xff] }
  0x18   :  { %2081 = vmatprep.subr.bf16.mxu1 %v2924_v18  ;;  %v25_v23 = vld [vmem:[%s3695_s3] sm:$0xff] }
  0x1a   :  { %2051 = vmatpush1.bf16.msra.mxu0 %v2903_v7 }
  0x1b   :  { %2053 = vmatprep.subr.bf16.mxu0 %v2906_v10  ;;  %2083 = vmatpush1.bf16.msra.mxu1 %v2951_v31 }
  0x1c   :  { %2085 = vmatprep.subr.bf16.mxu1 %v2954_v32 }
  0x1e   :  { %2055 = vmatpush1.bf16.msra.mxu0 %v2939_v24 }
  0x1f   :  { %2057 = vmatprep.subr.bf16.mxu0 %v2942_v27  ;;  %2087 = vmatpush1.bf16.msra.mxu1 %v2973_v40 }
  0x20   :  { %2089 = vmatprep.subr.bf16.mxu1 %v2976_v41 }
  0x22   :  { %2059 = vmatpush1.bf16.msra.mxu0 %v2969_v39 }
  0x23   :  { %2093 = vmatprep.subr.bf16.mxu0 %v2711_v4  ;;  %2091 = vmatpush1.bf16.msra.mxu1 %v2989_v49 }
  0x24   :  { %2125 = vmatprep.subr.bf16.mxu1 %v2763_v22 }
  0x25   :  { %162 = vmatmul.mubr.f32.vlgmr.msra.gmra.mrb[0].mxu0 %v23_v47 }
  0x26   :  { %2095 = vmatpush1.bf16.msra.mxu0 %v2722_v8  ;;  %401 = vmatprep.mubr.f32.mxu0 %v2669_v3 }
  0x27   :  { %2097 = vmatprep.subr.bf16.mxu0 %v2724_v9  ;;  %233 = vmatmul.mubr.f32.vlgmr.msra.gmra.mrb[0].mxu1 %v23_v47 }
  0x28   :  { %2127 = vmatpush1.bf16.msra.mxu1 %v2771_v25  ;;  %472 = vmatprep.mubr.f32.mxu1 %v2669_v3 }
  0x29   :  { %2129 = vmatprep.subr.bf16.mxu1 %v2796_v33 }
  0x2a   :  { %2099 = vmatpush1.bf16.msra.mxu0 %v2740_v14 }
  0x2b   :  { %2101 = vmatprep.subr.bf16.mxu0 %v2749_v17 }
  0x2c   :  { %2131 = vmatpush1.bf16.msra.mxu1 %v2807_v37 }
  0x2d   :  { %2133 = vmatprep.subr.bf16.mxu1 %v2831_v45 }
  0x2e   :  { %2103 = vmatpush1.bf16.msra.mxu0 %v2774_v26 }
  0x2f   :  { %2105 = vmatprep.subr.bf16.mxu0 %v2787_v30 }
  0x30   :  { %2135 = vmatpush1.bf16.msra.mxu1 %v2840_v48 }
  0x31   :  { %2137 = vmatprep.subr.bf16.mxu1 %v2852_v52 }
  0x32   :  { %2107 = vmatpush1.bf16.msra.mxu0 %v2823_v42 }
  0x33   :  { %2109 = vmatprep.subr.bf16.mxu0 %v2834_v46 }
  0x34   :  { %2139 = vmatpush1.bf16.msra.mxu1 %v2882_v62 }
  0x35   :  { %2141 = vmatprep.subr.bf16.mxu1 %v2888_v0 }
  0x36   :  { %2111 = vmatpush1.bf16.msra.mxu0 %v2861_v55 }
  0x37   :  { %2113 = vmatprep.subr.bf16.mxu0 %v2870_v58 }
  0x38   :  { %2143 = vmatpush1.bf16.msra.mxu1 %v2918_v15 }
  0x39   :  { %2145 = vmatprep.subr.bf16.mxu1 %v2924_v18 }
  0x3a   :  { %2115 = vmatpush1.bf16.msra.mxu0 %v2903_v7 }
  0x3b   :  { %2117 = vmatprep.subr.bf16.mxu0 %v2906_v10 }
  0x3c   :  { %2147 = vmatpush1.bf16.msra.mxu1 %v2951_v31 }
  0x3d   :  { %2149 = vmatprep.subr.bf16.mxu1 %v2954_v32 }
  0x3e   :  { %2119 = vmatpush1.bf16.msra.mxu0 %v2939_v24 }
  0x3f   :  { %2121 = vmatprep.subr.bf16.mxu0 %v2942_v27 }
  0x40   :  { %2151 = vmatpush1.bf16.msra.mxu1 %v2973_v40 }
  0x41   :  { %2153 = vmatprep.subr.bf16.mxu1 %v2976_v41 }
  0x42   :  { %2123 = vmatpush1.bf16.msra.mxu0 %v2969_v39 }
  0x43   :  { %2157 = vmatprep.subr.bf16.mxu0 %v2711_v4 }
  0x44   :  { %2155 = vmatpush1.bf16.msra.mxu1 %v2989_v49 }
  0x45   :  { %2189 = vmatprep.subr.bf16.mxu1 %v2763_v22 }
  0xf8   :  { %v163_v53 = vpop.f32.mrb[0].mxu0 }
  0xf9   :  { %v239_v54 = vadd.f32 %v163_v53, %v29_v50  ;;  %v165_v56 = vpop.f32.mrb[1].mxu0 }
  0xfa   :  { %v240_v57 = vadd.f32 %v165_v56, %v30_v51  ;;  %v234_v63 = vpop.f32.mrb[0].mxu1 }
  0xfb   :  { %v1969_v59 = vmul.f32 -1.442695, %v239_v54  ;;  %v236_v1 = vpop.f32.mrb[1].mxu1  ;;  %v241_v11 = vadd.f32 %v234_v63, %v31_v5 }
  0xfc   :  { %v1970_v60 = vmul.f32 -1.442695, %v240_v57  ;;  %v242_v2 = vadd.f32 %v236_v1, %v32_v61 }
  0xfd   :  { %2541 = vpow2.f32 %v1969_v59 }
  0xfe   :  { %2543 = vpow2.f32 %v1970_v60  ;;  %v1971_v6 = vmul.f32 -1.442695, %v242_v2 }
 0x100   :  { %2545 = vpow2.f32 %v1971_v6 }
 0x101   :  { %2547 = vtanh.f32 %v241_v11 }
 0x107   :  { %v2542_v12 = vpop.eup %2541 }
 0x108   :  { %v2544_v13 = vpop.eup %2543  ;;  %v246_v16 = vadd.f32 1.0, %v2542_v12 }
 0x109   :  { %v252_v19 = vadd.f32 1.0, %v2544_v13 }
 0x10a   :  { %2549 = vrcp.f32 %v246_v16  ;;  %v2546_v20 = vpop.eup %2545  ;;  %v799_v16 = vld [vmem:[%s3692_s1 + $0x160] sm:$0xff] }
 0x10b   :  { %2551 = vrcp.f32 %v252_v19  ;;  %v2548_v21 = vpop.eup %2547  ;;  %v259_v29 = vadd.f32 1.0, %v2546_v20  ;;  %v804_v19 = vld [vmem:[%s3692_s1 + $0x188] sm:$0xff] }
 0x10c   :  { %v808_v20 = vld [vmem:[%s3692_s1 + $0x1a8] sm:$0xff] }
 0x10d   :  { %2553 = vrcp.f32 %v259_v29  ;;  %v807_v29 = vld [vmem:[%s3692_s1 + $0x1a0] sm:$0xff] }
 0x114   :  { %v2550_v28 = vpop.eup %2549 }
 0x115   :  { %v2552_v34 = vpop.eup %2551  ;;  %v263_v35 = vmul.f32 %v2550_v28, %v2548_v21  ;;  %v803_v28 = vld [vmem:[%s3692_s1 + $0x180] sm:$0xff] }
 0x116   :  { %v262_v36 = vmul.f32 %v2552_v34, %v25_v23  ;;  %v3191_v23 = vpack.c.bf16 %v808_v20, %v804_v19  ;;  %v812_v34 = vld [vmem:[%s3692_s1 + $0x1c8] sm:$0xff]  ;;  %v1007_v19 = vld [vmem:[%s3692_s1 + $0x58] sm:$0xff] }
 0x117   :  { %v2554_v43 = vpop.eup %2553 }
 0x118   :  { %v3044_v38 = vadd.f32 %v263_v35, %v262_v36  ;;  %v816_v35 = vld [vmem:[%s3692_s1 + $0x1e8] sm:$0xff]  ;;  %v3207_v36 = vpack.c.bf16 %v807_v29, %v803_v28  ;;  %v1011_v28 = vld [vmem:[%s3692_s1 + $0x78] sm:$0xff]  ;;  %v1004_v29 = vld [vmem:[%s3692_s1 + $0x40] sm:$0xff] }
 0x11a   :  { %2555 = vtanh.f32 %v3044_v38 }
 0x124   :  { %v2556_v44 = vpop.eup %2555 }
 0x125   :  { %v266_v47 = vmul.f32 %v2556_v44, %v2554_v43  ;;  %v811_v43 = vld [vmem:[%s3692_s1 + $0x1c0] sm:$0xff] }
 0x126   :  { %v815_v44 = vld [vmem:[%s3692_s1 + $0x1e0] sm:$0xff] }
 0x127   :  { %267 = vst [vmem:[%s3696_s4] sm:$0xff] %v266_v47  ;;  %402 = vmatmul.mubr.f32.vlgmr.msra.gmra.mrb[2].mxu0 %v266_v47  ;;  %473 = vmatmul.mubr.f32.vlgmr.msra.gmra.mrb[2].mxu1 %v266_v47  ;;  %v3219_v47 = vpack.c.bf16 %v815_v44, %v811_v43  ;;  %v1006_v44 = vld [vmem:[%s3692_s1 + $0x50] sm:$0xff] }
 0x128   :  { %2159 = vmatpush1.bf16.msra.mxu0 %v2722_v8  ;;  %2191 = vmatpush1.bf16.msra.mxu1 %v2771_v25 }
 0x129   :  { %2161 = vmatprep.subr.bf16.mxu0 %v2724_v9  ;;  %2193 = vmatprep.subr.bf16.mxu1 %v2796_v33 }
 0x12a   :  { %642 = vmatprep.mubr.f32.mxu0 %v2669_v3  ;;  %713 = vmatprep.mubr.f32.mxu1 %v2669_v3 }
 0x12c   :  { %2163 = vmatpush1.bf16.msra.mxu0 %v2740_v14  ;;  %2195 = vmatpush1.bf16.msra.mxu1 %v2807_v37 }
 0x12d   :  { %2165 = vmatprep.subr.bf16.mxu0 %v2749_v17  ;;  %2197 = vmatprep.subr.bf16.mxu1 %v2831_v45 }
 0x130   :  { %2167 = vmatpush1.bf16.msra.mxu0 %v2774_v26  ;;  %2199 = vmatpush1.bf16.msra.mxu1 %v2840_v48  ;;  %v1972_v26 = vld [vmem:[%s3694_s0 + $0x20] sm:$0xff] }
 0x131   :  { %2169 = vmatprep.subr.bf16.mxu0 %v2787_v30  ;;  %2201 = vmatprep.subr.bf16.mxu1 %v2852_v52  ;;  %v1973_v30 = vld [vmem:[%s3694_s0 + $0x28] sm:$0xff] }
 0x134   :  { %2171 = vmatpush1.bf16.msra.mxu0 %v2823_v42  ;;  %2203 = vmatpush1.bf16.msra.mxu1 %v2882_v62 }
 0x135   :  { %2173 = vmatprep.subr.bf16.mxu0 %v2834_v46  ;;  %2205 = vmatprep.subr.bf16.mxu1 %v2888_v0 }
 0x138   :  { %2175 = vmatpush1.bf16.msra.mxu0 %v2861_v55  ;;  %2207 = vmatpush1.bf16.msra.mxu1 %v2918_v15 }
 0x139   :  { %2177 = vmatprep.subr.bf16.mxu0 %v2870_v58  ;;  %2209 = vmatprep.subr.bf16.mxu1 %v2924_v18 }
 0x13c   :  { %2179 = vmatpush1.bf16.msra.mxu0 %v2903_v7  ;;  %2211 = vmatpush1.bf16.msra.mxu1 %v2951_v31 }
 0x13d   :  { %2181 = vmatprep.subr.bf16.mxu0 %v2906_v10  ;;  %2213 = vmatprep.subr.bf16.mxu1 %v2954_v32 }
 0x140   :  { %2183 = vmatpush1.bf16.msra.mxu0 %v2939_v24  ;;  %2215 = vmatpush1.bf16.msra.mxu1 %v2973_v40 }
 0x141   :  { %2185 = vmatprep.subr.bf16.mxu0 %v2942_v27  ;;  %2217 = vmatprep.subr.bf16.mxu1 %v2976_v41 }
 0x144   :  { %2187 = vmatpush1.bf16.msra.mxu0 %v2969_v39  ;;  %2219 = vmatpush1.bf16.msra.mxu1 %v2989_v49  ;;  %v1974_v39 = vld [vmem:[%s3694_s0 + $0x30] sm:$0xff] }
 0x145   :  { %2221 = vmatprep.subr.bf16.mxu0 %v2711_v4  ;;  %2253 = vmatprep.subr.bf16.mxu1 %v2763_v22  ;;  %v1975_v4 = vld [vmem:[%s3694_s0 + $0x38] sm:$0xff] }
 0x1fa   :  { %v403_v42 = vpop.f32.mrb[2].mxu0  ;;  %v474_v46 = vpop.f32.mrb[2].mxu1 }
 0x1fb   :  { %v479_v55 = vadd.f32 %v1972_v26, %v403_v42  ;;  %v405_v58 = vpop.f32.mrb[3].mxu0  ;;  %v476_v7 = vpop.f32.mrb[3].mxu1  ;;  %v481_v51 = vadd.f32 %v1974_v39, %v474_v46  ;;  %v1980_v26 = vld [vmem:[%s3694_s0 + $0x40] sm:$0xff]  ;;  %v1982_v39 = vld [vmem:[%s3694_s0 + $0x50] sm:$0xff] }
 0x1fc   :  { %v480_v10 = vadd.f32 %v1973_v30, %v405_v58  ;;  %v482_v22 = vadd.f32 %v1975_v4, %v476_v7  ;;  %v1981_v30 = vld [vmem:[%s3694_s0 + $0x48] sm:$0xff]  ;;  %v1983_v4 = vld [vmem:[%s3694_s0 + $0x58] sm:$0xff] }
 0x1fd   :  { %v1976_v24 = vmul.f32 -1.442695, %v479_v55 }
 0x1fe   :  { %v1977_v27 = vmul.f32 -1.442695, %v480_v10  ;;  %v1978_v50 = vmul.f32 -1.442695, %v482_v22 }
 0x1ff   :  { %2557 = vpow2.f32 %v1976_v24 }
 0x200   :  { %2559 = vpow2.f32 %v1977_v27 }
 0x201   :  { %2561 = vpow2.f32 %v1978_v50 }
 0x202   :  { %2563 = vtanh.f32 %v481_v51 }
 0x209   :  { %v2558_v53 = vpop.eup %2557 }
 0x20a   :  { %v2560_v54 = vpop.eup %2559  ;;  %v486_v56 = vadd.f32 1.0, %v2558_v53 }
 0x20b   :  { %v492_v57 = vadd.f32 1.0, %v2560_v54  ;;  %v2562_v59 = vpop.eup %2561 }
 0x20c   :  { %2565 = vrcp.f32 %v486_v56  ;;  %v2564_v60 = vpop.eup %2563  ;;  %v499_v2 = vadd.f32 1.0, %v2562_v59 }
 0x20d   :  { %2567 = vrcp.f32 %v492_v57 }
 0x20e   :  { %2569 = vrcp.f32 %v499_v2 }
 0x216   :  { %v2566_v61 = vpop.eup %2565 }
 0x217   :  { %v2568_v63 = vpop.eup %2567  ;;  %v503_v1 = vmul.f32 %v2566_v61, %v2564_v60 }
 0x218   :  { %v502_v5 = vmul.f32 %v2568_v63, %v3044_v38  ;;  %v2570_v11 = vpop.eup %2569  ;;  %v3210_v38 = vpack.c.bf16 %v816_v35, %v812_v34  ;;  %v1008_v34 = vld [vmem:[%s3692_s1 + $0x60] sm:$0xff]  ;;  %v3300_v35 = vpack.c.bf16 %v1011_v28, %v1007_v19  ;;  %v1058_v19 = vld [vmem:[%s3692_s1 + $0x1f0] sm:$0xff] }
 0x219   :  { %v3302_v43 = vpack.c.bf16 %v1008_v34, %v1004_v29  ;;  %v1988_v29 = vld [vmem:[%s3694_s0 + $0x60] sm:$0xff]  ;;  %v1989_v34 = vld [vmem:[%s3694_s0 + $0x68] sm:$0xff] }
 0x21a   :  { %v3097_v6 = vadd.f32 %v503_v1, %v502_v5 }
 0x21c   :  { %2571 = vtanh.f32 %v3097_v6 }
 0x226   :  { %v2572_v12 = vpop.eup %2571 }
 0x227   :  { %v506_v13 = vmul.f32 %v2572_v12, %v2570_v11 }
 0x229   :  { %1979 = vst [vmem:[%s3696_s4 + $0x8] sm:$0xff] %v506_v13  ;;  %643 = vmatmul.mubr.f32.vlgmr.msra.gmra.mrb[4].mxu0 %v506_v13  ;;  %714 = vmatmul.mubr.f32.vlgmr.msra.gmra.mrb[4].mxu1 %v506_v13 }
 0x22a   :  { %2223 = vmatpush1.bf16.msra.mxu0 %v2722_v8  ;;  %2255 = vmatpush1.bf16.msra.mxu1 %v2771_v25  ;;  %v771_v8 = vld [vmem:[%s3692_s1 + $0x80] sm:$0xff]  ;;  %v784_v25 = vld [vmem:[%s3692_s1 + $0xe8] sm:$0xff] }
 0x22b   :  { %2225 = vmatprep.subr.bf16.mxu0 %v2724_v9  ;;  %2257 = vmatprep.subr.bf16.mxu1 %v2796_v33  ;;  %v775_v9 = vld [vmem:[%s3692_s1 + $0xa0] sm:$0xff] }
 0x22c   :  { %883 = vmatprep.mubr.f32.mxu0 %v2669_v3  ;;  %954 = vmatprep.mubr.f32.mxu1 %v2669_v3 }
 0x22e   :  { %2227 = vmatpush1.bf16.msra.mxu0 %v2740_v14  ;;  %2259 = vmatpush1.bf16.msra.mxu1 %v2807_v37  ;;  %v3130_v14 = vpack.c.bf16 %v775_v9, %v771_v8  ;;  %v779_v37 = vld [vmem:[%s3692_s1 + $0xc0] sm:$0xff]  ;;  %v1001_v9 = vld [vmem:[%s3692_s1 + $0x28] sm:$0xff] }
 0x22f   :  { %2229 = vmatprep.subr.bf16.mxu0 %v2749_v17  ;;  %2261 = vmatprep.subr.bf16.mxu1 %v2831_v45  ;;  %v780_v17 = vld [vmem:[%s3692_s1 + $0xc8] sm:$0xff]  ;;  %v783_v45 = vld [vmem:[%s3692_s1 + $0xe0] sm:$0xff] }
 0x230   :  { %v3139_v33 = vpack.c.bf16 %v784_v25, %v780_v17  ;;  %v999_v17 = vld [vmem:[%s3692_s1 + $0x18] sm:$0xff] }
 0x232   :  { %2263 = vmatpush1.bf16.msra.mxu1 %v2840_v48  ;;  %2231 = vmatpush1.bf16.msra.mxu0 %v3130_v14  ;;  %v3147_v48 = vpack.c.bf16 %v783_v45, %v779_v37  ;;  %v1003_v37 = vld [vmem:[%s3692_s1 + $0x38] sm:$0xff]  ;;  %v996_v45 = vld [vmem:[%s3692_s1] sm:$0xff] }
 0x233   :  { %2265 = vmatprep.subr.bf16.mxu1 %v2852_v52  ;;  %2233 = vmatprep.subr.bf16.mxu0 %v3139_v33  ;;  %v788_v52 = vld [vmem:[%s3692_s1 + $0x108] sm:$0xff] }
 0x236   :  { %2267 = vmatpush1.bf16.msra.mxu1 %v2882_v62  ;;  %2235 = vmatpush1.bf16.msra.mxu0 %v3147_v48  ;;  %v792_v62 = vld [vmem:[%s3692_s1 + $0x128] sm:$0xff] }
 0x237   :  { %2269 = vmatprep.subr.bf16.mxu1 %v2888_v0  ;;  %v3157_v0 = vpack.c.bf16 %v792_v62, %v788_v52  ;;  %v1000_v52 = vld [vmem:[%s3692_s1 + $0x20] sm:$0xff]  ;;  %v3264_v62 = vpack.c.bf16 %v1003_v37, %v999_v17  ;;  %v1046_v37 = vld [vmem:[%s3692_s1 + $0x190] sm:$0xff] }
 0x239   :  { %2237 = vmatprep.subr.bf16.mxu0 %v3157_v0 }
 0x23a   :  { %2271 = vmatpush1.bf16.msra.mxu1 %v2918_v15  ;;  %v787_v15 = vld [vmem:[%s3692_s1 + $0x100] sm:$0xff] }
 0x23b   :  { %2273 = vmatprep.subr.bf16.mxu1 %v2924_v18  ;;  %v791_v18 = vld [vmem:[%s3692_s1 + $0x120] sm:$0xff] }
 0x23e   :  { %2275 = vmatpush1.bf16.msra.mxu1 %v2951_v31  ;;  %v3165_v31 = vpack.c.bf16 %v791_v18, %v787_v15  ;;  %v3266_v15 = vpack.c.bf16 %v1000_v52, %v996_v45  ;;  %v998_v18 = vld [vmem:[%s3692_s1 + $0x10] sm:$0xff]  ;;  %v1055_v52 = vld [vmem:[%s3692_s1 + $0x1d8] sm:$0xff] }
 0x23f   :  { %2277 = vmatprep.subr.bf16.mxu1 %v2954_v32  ;;  %v796_v32 = vld [vmem:[%s3692_s1 + $0x148] sm:$0xff]  ;;  %v1050_v45 = vld [vmem:[%s3692_s1 + $0x1b0] sm:$0xff] }
 0x240   :  { %2239 = vmatpush1.bf16.msra.mxu0 %v3165_v31 }
 0x242   :  { %2279 = vmatpush1.bf16.msra.mxu1 %v2973_v40  ;;  %v800_v40 = vld [vmem:[%s3692_s1 + $0x168] sm:$0xff] }
 0x243   :  { %2281 = vmatprep.subr.bf16.mxu1 %v2976_v41  ;;  %v795_v41 = vld [vmem:[%s3692_s1 + $0x140] sm:$0xff] }
 0x244   :  { %v3189_v21 = vpack.c.bf16 %v799_v16, %v795_v41  ;;  %v1005_v41 = vld [vmem:[%s3692_s1 + $0x48] sm:$0xff] }
 0x245   :  { %v1009_v16 = vld [vmem:[%s3692_s1 + $0x68] sm:$0xff] }
 0x246   :  { %2283 = vmatpush1.bf16.msra.mxu1 %v2989_v49  ;;  %v3178_v49 = vpack.c.bf16 %v800_v40, %v796_v32  ;;  %v1002_v32 = vld [vmem:[%s3692_s1 + $0x30] sm:$0xff]  ;;  %v3289_v20 = vpack.c.bf16 %v1009_v16, %v1005_v41 }
 0x247   :  { %v3275_v40 = vpack.c.bf16 %v1002_v32, %v998_v18  ;;  %2317 = vmatprep.subr.bf16.mxu1 %v3264_v62  ;;  %v1059_v18 = vld [vmem:[%s3692_s1 + $0x1f8] sm:$0xff]  ;;  %v3425_v32 = vpack.c.bf16 %v1050_v45, %v1046_v37  ;;  %v1054_v16 = vld [vmem:[%s3692_s1 + $0x1d0] sm:$0xff] }
 0x248   :  { %2241 = vmatprep.subr.bf16.mxu0 %v3178_v49  ;;  %v3428_v41 = vpack.c.bf16 %v1059_v18, %v1055_v52  ;;  %v3439_v28 = vpack.c.bf16 %v1058_v19, %v1054_v16 }
 0x249   :  { %2243 = vmatpush1.bf16.msra.mxu0 %v3189_v21 }
 0x24a   :  { %2245 = vmatprep.subr.bf16.mxu0 %v3191_v23 }
 0x24d   :  { %2247 = vmatpush1.bf16.msra.mxu0 %v3207_v36 }
 0x24e   :  { %2249 = vmatprep.subr.bf16.mxu0 %v3210_v38 }
 0x251   :  { %2251 = vmatpush1.bf16.msra.mxu0 %v3219_v47 }
 0x2fc   :  { %v644_v42 = vpop.f32.mrb[4].mxu0  ;;  %v715_v46 = vpop.f32.mrb[4].mxu1 }
 0x2fd   :  { %v720_v55 = vadd.f32 %v1980_v26, %v644_v42  ;;  %v646_v58 = vpop.f32.mrb[5].mxu0  ;;  %v717_v7 = vpop.f32.mrb[5].mxu1  ;;  %v722_v51 = vadd.f32 %v1982_v39, %v715_v46  ;;  %v1010_v26 = vld [vmem:[%s3692_s1 + $0x70] sm:$0xff]  ;;  %v1013_v42 = vld [vmem:[%s3692_s1 + $0x88] sm:$0xff]  ;;  %v1027_v39 = vld [vmem:[%s3692_s1 + $0xf8] sm:$0xff] }
 0x2fe   :  { %v721_v10 = vadd.f32 %v1981_v30, %v646_v58  ;;  %v723_v22 = vadd.f32 %v1983_v4, %v717_v7  ;;  %v3311_v30 = vpack.c.bf16 %v1010_v26, %v1006_v44  ;;  %v1017_v46 = vld [vmem:[%s3692_s1 + $0xa8] sm:$0xff]  ;;  %v1019_v7 = vld [vmem:[%s3692_s1 + $0xb8] sm:$0xff] }
 0x2ff   :  { %v1984_v24 = vmul.f32 -1.442695, %v720_v55  ;;  %v1015_v55 = vld [vmem:[%s3692_s1 + $0x98] sm:$0xff]  ;;  %v3325_v58 = vpack.c.bf16 %v1017_v46, %v1013_v42 }
 0x300   :  { %v1985_v27 = vmul.f32 -1.442695, %v721_v10  ;;  %v1986_v50 = vmul.f32 -1.442695, %v723_v22  ;;  %v1014_v10 = vld [vmem:[%s3692_s1 + $0x90] sm:$0xff]  ;;  %v1023_v22 = vld [vmem:[%s3692_s1 + $0xd8] sm:$0xff] }
 0x301   :  { %2573 = vpow2.f32 %v1984_v24  ;;  %v1018_v24 = vld [vmem:[%s3692_s1 + $0xb0] sm:$0xff] }
 0x302   :  { %2575 = vpow2.f32 %v1985_v27  ;;  %v3336_v27 = vpack.c.bf16 %v1019_v7, %v1015_v55  ;;  %v3338_v4 = vpack.c.bf16 %v1018_v24, %v1014_v10 }
 0x303   :  { %2577 = vpow2.f32 %v1986_v50  ;;  %v3351_v50 = vpack.c.bf16 %v1027_v39, %v1023_v22  ;;  %v1991_v22 = vld [vmem:[%s3694_s0 + $0x78] sm:$0xff] }
 0x304   :  { %2579 = vtanh.f32 %v722_v51  ;;  %v1022_v51 = vld [vmem:[%s3692_s1 + $0xd0] sm:$0xff] }
 0x30b   :  { %v2574_v53 = vpop.eup %2573 }
 0x30c   :  { %v2576_v54 = vpop.eup %2575  ;;  %v727_v56 = vadd.f32 1.0, %v2574_v53  ;;  %v1026_v53 = vld [vmem:[%s3692_s1 + $0xf0] sm:$0xff] }
 0x30d   :  { %v733_v57 = vadd.f32 1.0, %v2576_v54  ;;  %v2578_v59 = vpop.eup %2577  ;;  %v3359_v54 = vpack.c.bf16 %v1026_v53, %v1022_v51  ;;  %v1990_v51 = vld [vmem:[%s3694_s0 + $0x70] sm:$0xff] }
 0x30e   :  { %2581 = vrcp.f32 %v727_v56  ;;  %v2580_v60 = vpop.eup %2579  ;;  %v740_v2 = vadd.f32 1.0, %v2578_v59  ;;  %v1031_v56 = vld [vmem:[%s3692_s1 + $0x118] sm:$0xff] }
 0x30f   :  { %2583 = vrcp.f32 %v733_v57  ;;  %v1035_v57 = vld [vmem:[%s3692_s1 + $0x138] sm:$0xff] }
 0x310   :  { %2585 = vrcp.f32 %v740_v2  ;;  %v3371_v59 = vpack.c.bf16 %v1035_v57, %v1031_v56  ;;  %v1043_v2 = vld [vmem:[%s3692_s1 + $0x178] sm:$0xff] }
 0x318   :  { %v2582_v61 = vpop.eup %2581 }
 0x319   :  { %v2584_v63 = vpop.eup %2583  ;;  %v744_v1 = vmul.f32 %v2582_v61, %v2580_v60  ;;  %v1030_v60 = vld [vmem:[%s3692_s1 + $0x110] sm:$0xff] }
 0x31a   :  { %v743_v5 = vmul.f32 %v2584_v63, %v3097_v6  ;;  %v2586_v12 = vpop.eup %2585  ;;  %v997_v6 = vld [vmem:[%s3692_s1 + $0x8] sm:$0xff]  ;;  %v1034_v61 = vld [vmem:[%s3692_s1 + $0x130] sm:$0xff] }
 0x31b   :  { %v3253_v25 = vpack.c.bf16 %v1001_v9, %v997_v6  ;;  %v3379_v63 = vpack.c.bf16 %v1034_v61, %v1030_v60  ;;  %v1051_v6 = vld [vmem:[%s3692_s1 + $0x1b8] sm:$0xff] }
 0x31c   :  { %v3236_v11 = vadd.f32 %v744_v1, %v743_v5  ;;  %v1039_v1 = vld [vmem:[%s3692_s1 + $0x158] sm:$0xff]  ;;  %v1038_v5 = vld [vmem:[%s3692_s1 + $0x150] sm:$0xff] }
 0x31d   :  { %2285 = vmatprep.subr.bf16.mxu0 %v3253_v25 }
 0x31e   :  { %2587 = vtanh.f32 %v3236_v11 }
 0x328   :  { %v2588_v13 = vpop.eup %2587 }
 0x329   :  { %v747_v8 = vmul.f32 %v2588_v13, %v2586_v12  ;;  %v3392_v12 = vpack.c.bf16 %v1043_v2, %v1039_v1  ;;  %v1042_v13 = vld [vmem:[%s3692_s1 + $0x170] sm:$0xff] }
 0x32a   :  { %v3405_v9 = vpack.c.bf16 %v1042_v13, %v1038_v5 }
 0x32b   :  { %1987 = vst [vmem:[%s3696_s4 + $0x10] sm:$0xff] %v747_v8  ;;  %884 = vmatmul.mubr.f32.vlgmr.msra.gmra.mrb[6].mxu0 %v747_v8  ;;  %955 = vmatmul.mubr.f32.vlgmr.msra.gmra.mrb[6].mxu1 %v747_v8  ;;  %v1047_v8 = vld [vmem:[%s3692_s1 + $0x198] sm:$0xff] }
 0x32c   :  { %1124 = vmatprep.mubr.f32.mxu0 %v2669_v3  ;;  %1195 = vmatprep.mubr.f32.mxu1 %v2669_v3  ;;  %v3408_v17 = vpack.c.bf16 %v1051_v6, %v1047_v8 }
 0x32d   :  { %2287 = vmatpush1.bf16.msra.mxu0 %v3266_v15  ;;  %2319 = vmatpush1.bf16.msra.mxu1 %v3275_v40 }
 0x32e   :  { %2289 = vmatprep.subr.bf16.mxu0 %v3289_v20  ;;  %2321 = vmatprep.subr.bf16.mxu1 %v3300_v35 }
 0x331   :  { %2291 = vmatpush1.bf16.msra.mxu0 %v3302_v43  ;;  %2323 = vmatpush1.bf16.msra.mxu1 %v3311_v30 }
 0x332   :  { %2293 = vmatprep.subr.bf16.mxu0 %v3325_v58  ;;  %2325 = vmatprep.subr.bf16.mxu1 %v3336_v27 }
 0x335   :  { %2295 = vmatpush1.bf16.msra.mxu0 %v3130_v14  ;;  %2327 = vmatpush1.bf16.msra.mxu1 %v3338_v4 }
 0x336   :  { %2297 = vmatprep.subr.bf16.mxu0 %v3139_v33  ;;  %2329 = vmatprep.subr.bf16.mxu1 %v3351_v50 }
 0x339   :  { %2299 = vmatpush1.bf16.msra.mxu0 %v3147_v48  ;;  %2331 = vmatpush1.bf16.msra.mxu1 %v3359_v54 }
 0x33a   :  { %2301 = vmatprep.subr.bf16.mxu0 %v3157_v0  ;;  %2333 = vmatprep.subr.bf16.mxu1 %v3371_v59 }
 0x33d   :  { %2303 = vmatpush1.bf16.msra.mxu0 %v3165_v31  ;;  %2335 = vmatpush1.bf16.msra.mxu1 %v3379_v63 }
 0x33e   :  { %2305 = vmatprep.subr.bf16.mxu0 %v3178_v49  ;;  %2337 = vmatprep.subr.bf16.mxu1 %v3392_v12 }
 0x341   :  { %2307 = vmatpush1.bf16.msra.mxu0 %v3189_v21  ;;  %2339 = vmatpush1.bf16.msra.mxu1 %v3405_v9 }
 0x342   :  { %2309 = vmatprep.subr.bf16.mxu0 %v3191_v23  ;;  %2341 = vmatprep.subr.bf16.mxu1 %v3408_v17 }
 0x345   :  { %2311 = vmatpush1.bf16.msra.mxu0 %v3207_v36  ;;  %2343 = vmatpush1.bf16.msra.mxu1 %v3425_v32 }
 0x346   :  { %2313 = vmatprep.subr.bf16.mxu0 %v3210_v38  ;;  %2345 = vmatprep.subr.bf16.mxu1 %v3428_v41 }
 0x349   :  { %2315 = vmatpush1.bf16.msra.mxu0 %v3219_v47  ;;  %2347 = vmatpush1.bf16.msra.mxu1 %v3439_v28 }
 0x34a   :  { %2349 = vmatprep.subr.bf16.mxu0 %v3253_v25  ;;  %2381 = vmatprep.subr.bf16.mxu1 %v3264_v62 }
 0x3fe   :  { %v885_v44 = vpop.f32.mrb[6].mxu0  ;;  %v956_v26 = vpop.f32.mrb[6].mxu1 }
 0x3ff   :  { %v961_v42 = vadd.f32 %v1988_v29, %v885_v44  ;;  %v887_v46 = vpop.f32.mrb[7].mxu0  ;;  %v958_v55 = vpop.f32.mrb[7].mxu1  ;;  %v963_v56 = vadd.f32 %v1990_v51, %v956_v26  ;;  %v1997_v29 = vld [vmem:[%s3694_s0 + $0x88] sm:$0xff] }
 0x400   :  { %v962_v7 = vadd.f32 %v1989_v34, %v887_v46  ;;  %v964_v39 = vadd.f32 %v1991_v22, %v958_v55 }
 0x401   :  { %v1992_v10 = vmul.f32 -1.442695, %v961_v42 }
 0x402   :  { %v1993_v24 = vmul.f32 -1.442695, %v962_v7  ;;  %v1994_v53 = vmul.f32 -1.442695, %v964_v39  ;;  %v1998_v39 = vld [vmem:[%s3694_s0 + $0x90] sm:$0xff] }
 0x403   :  { %2589 = vpow2.f32 %v1992_v10 }
 0x404   :  { %2591 = vpow2.f32 %v1993_v24  ;;  %v1999_v24 = vld [vmem:[%s3694_s0 + $0x98] sm:$0xff] }
 0x405   :  { %2593 = vpow2.f32 %v1994_v53 }
 0x406   :  { %2595 = vtanh.f32 %v963_v56 }
 0x40d   :  { %v2590_v57 = vpop.eup %2589 }
 0x40e   :  { %v2592_v60 = vpop.eup %2591  ;;  %v968_v61 = vadd.f32 1.0, %v2590_v57 }
 0x40f   :  { %v974_v1 = vadd.f32 1.0, %v2592_v60  ;;  %v2594_v2 = vpop.eup %2593 }
 0x410   :  { %2597 = vrcp.f32 %v968_v61  ;;  %v2596_v5 = vpop.eup %2595  ;;  %v981_v37 = vadd.f32 1.0, %v2594_v2 }
 0x411   :  { %2599 = vrcp.f32 %v974_v1 }
 0x412   :  { %2601 = vrcp.f32 %v981_v37 }
 0x41a   :  { %v2598_v13 = vpop.eup %2597 }
 0x41b   :  { %v2600_v8 = vpop.eup %2599  ;;  %v985_v6 = vmul.f32 %v2598_v13, %v2596_v5 }
 0x41c   :  { %v984_v45 = vmul.f32 %v2600_v8, %v3236_v11  ;;  %v2602_v18 = vpop.eup %2601  ;;  %v1996_v11 = vld [vmem:[%s3694_s0 + $0x80] sm:$0xff] }
 0x41e   :  { %v3459_v52 = vadd.f32 %v985_v6, %v984_v45 }
 0x420   :  { %2603 = vtanh.f32 %v3459_v52 }
 0x42a   :  { %v2604_v16 = vpop.eup %2603 }
 0x42b   :  { %v988_v19 = vmul.f32 %v2604_v16, %v2602_v18 }
 0x42d   :  { %1995 = vst [vmem:[%s3696_s4 + $0x18] sm:$0xff] %v988_v19  ;;  %1125 = vmatmul.mubr.f32.vlgmr.msra.gmra.mrb[8].mxu0 %v988_v19  ;;  %1196 = vmatmul.mubr.f32.vlgmr.msra.gmra.mrb[8].mxu1 %v988_v19 }
 0x42e   :  { %2351 = vmatpush1.bf16.msra.mxu0 %v3266_v15  ;;  %2383 = vmatpush1.bf16.msra.mxu1 %v3275_v40 }
 0x42f   :  { %2353 = vmatprep.subr.bf16.mxu0 %v3289_v20  ;;  %2385 = vmatprep.subr.bf16.mxu1 %v3300_v35 }
 0x430   :  { %1365 = vmatprep.mubr.f32.mxu0 %v2669_v3  ;;  %1436 = vmatprep.mubr.f32.mxu1 %v2669_v3 }
 0x432   :  { %2355 = vmatpush1.bf16.msra.mxu0 %v3302_v43  ;;  %2387 = vmatpush1.bf16.msra.mxu1 %v3311_v30 }
 0x433   :  { %2357 = vmatprep.subr.bf16.mxu0 %v3325_v58  ;;  %2389 = vmatprep.subr.bf16.mxu1 %v3336_v27 }
 0x436   :  { %2359 = vmatpush1.bf16.msra.mxu0 %v3130_v14  ;;  %2391 = vmatpush1.bf16.msra.mxu1 %v3338_v4 }
 0x437   :  { %2361 = vmatprep.subr.bf16.mxu0 %v3139_v33  ;;  %2393 = vmatprep.subr.bf16.mxu1 %v3351_v50 }
 0x43a   :  { %2363 = vmatpush1.bf16.msra.mxu0 %v3147_v48  ;;  %2395 = vmatpush1.bf16.msra.mxu1 %v3359_v54 }
 0x43b   :  { %2365 = vmatprep.subr.bf16.mxu0 %v3157_v0  ;;  %2397 = vmatprep.subr.bf16.mxu1 %v3371_v59 }
 0x43e   :  { %2367 = vmatpush1.bf16.msra.mxu0 %v3165_v31  ;;  %2399 = vmatpush1.bf16.msra.mxu1 %v3379_v63 }
 0x43f   :  { %2369 = vmatprep.subr.bf16.mxu0 %v3178_v49  ;;  %2401 = vmatprep.subr.bf16.mxu1 %v3392_v12 }
 0x442   :  { %2371 = vmatpush1.bf16.msra.mxu0 %v3189_v21  ;;  %2403 = vmatpush1.bf16.msra.mxu1 %v3405_v9 }
 0x443   :  { %2373 = vmatprep.subr.bf16.mxu0 %v3191_v23  ;;  %2405 = vmatprep.subr.bf16.mxu1 %v3408_v17 }
 0x446   :  { %2375 = vmatpush1.bf16.msra.mxu0 %v3207_v36  ;;  %2407 = vmatpush1.bf16.msra.mxu1 %v3425_v32 }
 0x447   :  { %2377 = vmatprep.subr.bf16.mxu0 %v3210_v38  ;;  %2409 = vmatprep.subr.bf16.mxu1 %v3428_v41 }
 0x44a   :  { %2379 = vmatpush1.bf16.msra.mxu0 %v3219_v47  ;;  %2411 = vmatpush1.bf16.msra.mxu1 %v3439_v28 }
 0x44b   :  { %2413 = vmatprep.subr.bf16.mxu0 %v3253_v25  ;;  %2445 = vmatprep.subr.bf16.mxu1 %v3264_v62 }
 0x500   :  { %v1126_v34 = vpop.f32.mrb[8].mxu0  ;;  %v1197_v44 = vpop.f32.mrb[8].mxu1 }
 0x501   :  { %v1202_v26 = vadd.f32 %v1996_v11, %v1126_v34  ;;  %v1128_v42 = vpop.f32.mrb[9].mxu0  ;;  %v1199_v46 = vpop.f32.mrb[9].mxu1  ;;  %v1204_v53 = vadd.f32 %v1998_v39, %v1197_v44 }
 0x502   :  { %v1203_v55 = vadd.f32 %v1997_v29, %v1128_v42  ;;  %v1205_v22 = vadd.f32 %v1999_v24, %v1199_v46 }
 0x503   :  { %v2000_v7 = vmul.f32 -1.442695, %v1202_v26 }
 0x504   :  { %v2001_v10 = vmul.f32 -1.442695, %v1203_v55  ;;  %v2002_v51 = vmul.f32 -1.442695, %v1205_v22 }
 0x505   :  { %2605 = vpow2.f32 %v2000_v7 }
 0x506   :  { %2607 = vpow2.f32 %v2001_v10 }
 0x507   :  { %2609 = vpow2.f32 %v2002_v51 }
 0x508   :  { %2611 = vtanh.f32 %v1204_v53 }
 0x50f   :  { %v2606_v56 = vpop.eup %2605 }
 0x510   :  { %v2608_v57 = vpop.eup %2607  ;;  %v1209_v60 = vadd.f32 1.0, %v2606_v56 }
 0x511   :  { %v1215_v61 = vadd.f32 1.0, %v2608_v57  ;;  %v2610_v1 = vpop.eup %2609  ;;  %v1768_v57 = vld [vmem:[%s3692_s1 + $0x188] sm:$0xff] }
 0x512   :  { %2613 = vrcp.f32 %v1209_v60  ;;  %v2612_v2 = vpop.eup %2611  ;;  %v1222_v6 = vadd.f32 1.0, %v2610_v1  ;;  %v1772_v60 = vld [vmem:[%s3692_s1 + $0x1a8] sm:$0xff] }
 0x513   :  { %2615 = vrcp.f32 %v1215_v61  ;;  %v2500_v1 = vpack.c.bf16 %v1772_v60, %v1768_v57 }
 0x514   :  { %2617 = vrcp.f32 %v1222_v6 }
 0x51c   :  { %v2614_v5 = vpop.eup %2613 }
 0x51d   :  { %v2616_v13 = vpop.eup %2615  ;;  %v1226_v8 = vmul.f32 %v2614_v5, %v2612_v2  ;;  %v1767_v2 = vld [vmem:[%s3692_s1 + $0x180] sm:$0xff] }
 0x51e   :  { %v1225_v37 = vmul.f32 %v2616_v13, %v3459_v52  ;;  %v2618_v18 = vpop.eup %2617  ;;  %v1771_v5 = vld [vmem:[%s3692_s1 + $0x1a0] sm:$0xff]  ;;  %v1776_v13 = vld [vmem:[%s3692_s1 + $0x1c8] sm:$0xff] }
 0x51f   :  { %v2502_v6 = vpack.c.bf16 %v1771_v5, %v1767_v2 }
 0x520   :  { %v3512_v45 = vadd.f32 %v1226_v8, %v1225_v37  ;;  %v1780_v8 = vld [vmem:[%s3692_s1 + $0x1e8] sm:$0xff] }
 0x521   :  { %v2504_v37 = vpack.c.bf16 %v1780_v8, %v1776_v13 }
 0x522   :  { %2619 = vtanh.f32 %v3512_v45 }
 0x52c   :  { %v2620_v16 = vpop.eup %2619 }
 0x52d   :  { %v1229_v19 = vmul.f32 %v2620_v16, %v2618_v18  ;;  %v1779_v18 = vld [vmem:[%s3692_s1 + $0x1e0] sm:$0xff] }
 0x52f   :  { %2003 = vst [vmem:[%s3696_s4 + $0x20] sm:$0xff] %v1229_v19  ;;  %1366 = vmatmul.mubr.f32.vlgmr.msra.gmra.mrb[10].mxu0 %v1229_v19  ;;  %1437 = vmatmul.mubr.f32.vlgmr.msra.gmra.mrb[10].mxu1 %v1229_v19  ;;  %v2012_v19 = vld [vmem:[%s3694_s0 + $0xc0] sm:$0xff] }
 0x530   :  { %2415 = vmatpush1.bf16.msra.mxu0 %v3266_v15  ;;  %2447 = vmatpush1.bf16.msra.mxu1 %v3275_v40 }
 0x531   :  { %2417 = vmatprep.subr.bf16.mxu0 %v3289_v20  ;;  %2449 = vmatprep.subr.bf16.mxu1 %v3300_v35 }
 0x532   :  { %1606 = vmatprep.mubr.f32.mxu0 %v2669_v3  ;;  %1677 = vmatprep.mubr.f32.mxu1 %v2669_v3 }
 0x534   :  { %2419 = vmatpush1.bf16.msra.mxu0 %v3302_v43  ;;  %2451 = vmatpush1.bf16.msra.mxu1 %v3311_v30 }
 0x535   :  { %2421 = vmatprep.subr.bf16.mxu0 %v3325_v58  ;;  %2453 = vmatprep.subr.bf16.mxu1 %v3336_v27 }
 0x538   :  { %2423 = vmatpush1.bf16.msra.mxu0 %v3130_v14  ;;  %2455 = vmatpush1.bf16.msra.mxu1 %v3338_v4  ;;  %v2004_v14 = vld [vmem:[%s3694_s0 + $0xa0] sm:$0xff] }
 0x539   :  { %2425 = vmatprep.subr.bf16.mxu0 %v3139_v33  ;;  %2457 = vmatprep.subr.bf16.mxu1 %v3351_v50  ;;  %v2005_v33 = vld [vmem:[%s3694_s0 + $0xa8] sm:$0xff] }
 0x53c   :  { %2427 = vmatpush1.bf16.msra.mxu0 %v3147_v48  ;;  %2459 = vmatpush1.bf16.msra.mxu1 %v3359_v54 }
 0x53d   :  { %2429 = vmatprep.subr.bf16.mxu0 %v3157_v0  ;;  %2461 = vmatprep.subr.bf16.mxu1 %v3371_v59 }
 0x540   :  { %2431 = vmatpush1.bf16.msra.mxu0 %v3165_v31  ;;  %2463 = vmatpush1.bf16.msra.mxu1 %v3379_v63 }
 0x541   :  { %2433 = vmatprep.subr.bf16.mxu0 %v3178_v49  ;;  %2465 = vmatprep.subr.bf16.mxu1 %v3392_v12 }
 0x544   :  { %2435 = vmatpush1.bf16.msra.mxu0 %v3189_v21  ;;  %2467 = vmatpush1.bf16.msra.mxu1 %v3405_v9 }
 0x545   :  { %2437 = vmatprep.subr.bf16.mxu0 %v3191_v23  ;;  %2469 = vmatprep.subr.bf16.mxu1 %v3408_v17 }
 0x548   :  { %2439 = vmatpush1.bf16.msra.mxu0 %v3207_v36  ;;  %2471 = vmatpush1.bf16.msra.mxu1 %v3425_v32 }
 0x549   :  { %2441 = vmatprep.subr.bf16.mxu0 %v3210_v38  ;;  %2473 = vmatprep.subr.bf16.mxu1 %v3428_v41 }
 0x54c   :  { %2443 = vmatpush1.bf16.msra.mxu0 %v3219_v47  ;;  %2475 = vmatpush1.bf16.msra.mxu1 %v3439_v28  ;;  %v2007_v47 = vld [vmem:[%s3694_s0 + $0xb8] sm:$0xff] }
 0x54d   :  { %2477 = vmatprep.subr.bf16.mxu0 %v3253_v25  ;;  %2509 = vmatprep.subr.bf16.mxu1 %v3264_v62  ;;  %v2006_v62 = vld [vmem:[%s3694_s0 + $0xb0] sm:$0xff] }
 0x602   :  { %v1367_v48 = vpop.f32.mrb[10].mxu0  ;;  %v1438_v0 = vpop.f32.mrb[10].mxu1 }
 0x603   :  { %v1443_v31 = vadd.f32 %v2004_v14, %v1367_v48  ;;  %v1369_v49 = vpop.f32.mrb[11].mxu0  ;;  %v1440_v21 = vpop.f32.mrb[11].mxu1  ;;  %v1445_v11 = vadd.f32 %v2006_v62, %v1438_v0  ;;  %v2013_v14 = vld [vmem:[%s3694_s0 + $0xc8] sm:$0xff] }
 0x604   :  { %v1444_v23 = vadd.f32 %v2005_v33, %v1369_v49  ;;  %v1446_v25 = vadd.f32 %v2007_v47, %v1440_v21 }
 0x605   :  { %v2008_v36 = vmul.f32 -1.442695, %v1443_v31 }
 0x606   :  { %v2009_v38 = vmul.f32 -1.442695, %v1444_v23  ;;  %v2010_v52 = vmul.f32 -1.442695, %v1446_v25  ;;  %v2014_v25 = vld [vmem:[%s3694_s0 + $0xd0] sm:$0xff] }
 0x607   :  { %2621 = vpow2.f32 %v2008_v36 }
 0x608   :  { %2623 = vpow2.f32 %v2009_v38  ;;  %v2015_v38 = vld [vmem:[%s3694_s0 + $0xd8] sm:$0xff] }
 0x609   :  { %2625 = vpow2.f32 %v2010_v52 }
 0x60a   :  { %2627 = vtanh.f32 %v1445_v11 }
 0x611   :  { %v2622_v29 = vpop.eup %2621 }
 0x612   :  { %v2624_v34 = vpop.eup %2623  ;;  %v1450_v44 = vadd.f32 1.0, %v2622_v29 }
 0x613   :  { %v1456_v26 = vadd.f32 1.0, %v2624_v34  ;;  %v2626_v42 = vpop.eup %2625 }
 0x614   :  { %2629 = vrcp.f32 %v1450_v44  ;;  %v2628_v46 = vpop.eup %2627  ;;  %v1463_v24 = vadd.f32 1.0, %v2626_v42 }
 0x615   :  { %2631 = vrcp.f32 %v1456_v26 }
 0x616   :  { %2633 = vrcp.f32 %v1463_v24 }
 0x61e   :  { %v2630_v55 = vpop.eup %2629 }
 0x61f   :  { %v2632_v7 = vpop.eup %2631  ;;  %v1467_v10 = vmul.f32 %v2630_v55, %v2628_v46 }
 0x620   :  { %v1466_v22 = vmul.f32 %v2632_v7, %v3512_v45  ;;  %v2634_v51 = vpop.eup %2633  ;;  %v1775_v45 = vld [vmem:[%s3692_s1 + $0x1c0] sm:$0xff] }
 0x621   :  { %v2506_v16 = vpack.c.bf16 %v1779_v18, %v1775_v45 }
 0x622   :  { %v3565_v39 = vadd.f32 %v1467_v10, %v1466_v22 }
 0x624   :  { %2635 = vtanh.f32 %v3565_v39 }
 0x62e   :  { %v2636_v53 = vpop.eup %2635 }
 0x62f   :  { %v1470_v56 = vmul.f32 %v2636_v53, %v2634_v51 }
 0x631   :  { %2011 = vst [vmem:[%s3696_s4 + $0x28] sm:$0xff] %v1470_v56  ;;  %1607 = vmatmul.mubr.f32.vlgmr.msra.gmra.mrb[12].mxu0 %v1470_v56  ;;  %1678 = vmatmul.mubr.f32.vlgmr.msra.gmra.mrb[12].mxu1 %v1470_v56 }
 0x632   :  { %2479 = vmatpush1.bf16.msra.mxu0 %v3266_v15  ;;  %2511 = vmatpush1.bf16.msra.mxu1 %v3275_v40  ;;  %v1739_v15 = vld [vmem:[%s3692_s1 + $0xa0] sm:$0xff] }
 0x633   :  { %2481 = vmatprep.subr.bf16.mxu0 %v3289_v20  ;;  %2513 = vmatprep.subr.bf16.mxu1 %v3300_v35  ;;  %v1744_v20 = vld [vmem:[%s3692_s1 + $0xc8] sm:$0xff] }
 0x634   :  { %1847 = vmatprep.mubr.f32.mxu0 %v2669_v3  ;;  %1918 = vmatprep.mubr.f32.mxu1 %v2669_v3  ;;  %v1735_v3 = vld [vmem:[%s3692_s1 + $0x80] sm:$0xff]  ;;  %v1748_v35 = vld [vmem:[%s3692_s1 + $0xe8] sm:$0xff] }
 0x635   :  { %v2486_v40 = vpack.c.bf16 %v1739_v15, %v1735_v3  ;;  %v2020_v3 = vld [vmem:[%s3694_s0 + $0xe0] sm:$0xff] }
 0x636   :  { %2483 = vmatpush1.bf16.msra.mxu0 %v3302_v43  ;;  %2515 = vmatpush1.bf16.msra.mxu1 %v3311_v30  ;;  %v2488_v43 = vpack.c.bf16 %v1748_v35, %v1744_v20  ;;  %v1743_v30 = vld [vmem:[%s3692_s1 + $0xc0] sm:$0xff] }
 0x637   :  { %2485 = vmatprep.subr.bf16.mxu0 %v3325_v58  ;;  %2517 = vmatprep.subr.bf16.mxu1 %v3336_v27  ;;  %v1747_v58 = vld [vmem:[%s3692_s1 + $0xe0] sm:$0xff] }
 0x638   :  { %v2490_v27 = vpack.c.bf16 %v1747_v58, %v1743_v30 }
 0x63a   :  { %2519 = vmatpush1.bf16.msra.mxu1 %v3338_v4  ;;  %2487 = vmatpush1.bf16.msra.mxu0 %v2486_v40  ;;  %v1752_v4 = vld [vmem:[%s3692_s1 + $0x108] sm:$0xff] }
 0x63b   :  { %2521 = vmatprep.subr.bf16.mxu1 %v3351_v50  ;;  %2489 = vmatprep.subr.bf16.mxu0 %v2488_v43  ;;  %v1756_v50 = vld [vmem:[%s3692_s1 + $0x128] sm:$0xff] }
 0x63e   :  { %2523 = vmatpush1.bf16.msra.mxu1 %v3359_v54  ;;  %2491 = vmatpush1.bf16.msra.mxu0 %v2490_v27  ;;  %v2492_v54 = vpack.c.bf16 %v1756_v50, %v1752_v4  ;;  %v2023_v4 = vld [vmem:[%s3694_s0 + $0xf8] sm:$0xff] }
 0x63f   :  { %2525 = vmatprep.subr.bf16.mxu1 %v3371_v59  ;;  %v1751_v59 = vld [vmem:[%s3692_s1 + $0x100] sm:$0xff] }
 0x640   :  { %2493 = vmatprep.subr.bf16.mxu0 %v2492_v54  ;;  %v2022_v54 = vld [vmem:[%s3694_s0 + $0xf0] sm:$0xff] }
 0x642   :  { %2527 = vmatpush1.bf16.msra.mxu1 %v3379_v63  ;;  %v1755_v63 = vld [vmem:[%s3692_s1 + $0x120] sm:$0xff] }
 0x643   :  { %2529 = vmatprep.subr.bf16.mxu1 %v3392_v12  ;;  %v2494_v12 = vpack.c.bf16 %v1755_v63, %v1751_v59 }
 0x645   :  { %2495 = vmatpush1.bf16.msra.mxu0 %v2494_v12 }
 0x646   :  { %2531 = vmatpush1.bf16.msra.mxu1 %v3405_v9  ;;  %v1760_v9 = vld [vmem:[%s3692_s1 + $0x148] sm:$0xff] }
 0x647   :  { %2533 = vmatprep.subr.bf16.mxu1 %v3408_v17  ;;  %v1764_v17 = vld [vmem:[%s3692_s1 + $0x168] sm:$0xff] }
 0x64a   :  { %2535 = vmatpush1.bf16.msra.mxu1 %v3425_v32  ;;  %v1759_v32 = vld [vmem:[%s3692_s1 + $0x140] sm:$0xff] }
 0x64b   :  { %2537 = vmatprep.subr.bf16.mxu1 %v3428_v41  ;;  %v2496_v41 = vpack.c.bf16 %v1764_v17, %v1760_v9 }
 0x64d   :  { %2497 = vmatprep.subr.bf16.mxu0 %v2496_v41 }
 0x64e   :  { %2539 = vmatpush1.bf16.msra.mxu1 %v3439_v28  ;;  %v1763_v28 = vld [vmem:[%s3692_s1 + $0x160] sm:$0xff] }
 0x64f   :  { %v2498_v61 = vpack.c.bf16 %v1763_v28, %v1759_v32 }
 0x651   :  { %2499 = vmatpush1.bf16.msra.mxu0 %v2498_v61 }
 0x652   :  { %2501 = vmatprep.subr.bf16.mxu0 %v2500_v1 }
 0x655   :  { %2503 = vmatpush1.bf16.msra.mxu0 %v2502_v6 }
 0x656   :  { %2505 = vmatprep.subr.bf16.mxu0 %v2504_v37 }
 0x659   :  { %2507 = vmatpush1.bf16.msra.mxu0 %v2506_v16 }
 0x704   :  { %v1608_v33 = vpop.f32.mrb[12].mxu0  ;;  %v1679_v48 = vpop.f32.mrb[12].mxu1 }
 0x705   :  { %v1684_v0 = vadd.f32 %v2012_v19, %v1608_v33  ;;  %v1610_v31 = vpop.f32.mrb[13].mxu0  ;;  %v1681_v49 = vpop.f32.mrb[13].mxu1  ;;  %v1686_v52 = vadd.f32 %v2014_v25, %v1679_v48 }
 0x706   :  { %v1685_v21 = vadd.f32 %v2013_v14, %v1610_v31  ;;  %v1687_v47 = vadd.f32 %v2015_v38, %v1681_v49 }
 0x707   :  { %v2016_v23 = vmul.f32 -1.442695, %v1684_v0 }
 0x708   :  { %v2017_v36 = vmul.f32 -1.442695, %v1685_v21  ;;  %v2018_v62 = vmul.f32 -1.442695, %v1687_v47 }
 0x709   :  { %2637 = vpow2.f32 %v2016_v23 }
 0x70a   :  { %2639 = vpow2.f32 %v2017_v36 }
 0x70b   :  { %2641 = vpow2.f32 %v2018_v62 }
 0x70c   :  { %2643 = vtanh.f32 %v1686_v52 }
 0x713   :  { %v2638_v11 = vpop.eup %2637 }
 0x714   :  { %v2640_v29 = vpop.eup %2639  ;;  %v1691_v34 = vadd.f32 1.0, %v2638_v11 }
 0x715   :  { %v1697_v44 = vadd.f32 1.0, %v2640_v29  ;;  %v2642_v26 = vpop.eup %2641 }
 0x716   :  { %2645 = vrcp.f32 %v1691_v34  ;;  %v2644_v42 = vpop.eup %2643  ;;  %v1704_v10 = vadd.f32 1.0, %v2642_v26 }
 0x717   :  { %2647 = vrcp.f32 %v1697_v44 }
 0x718   :  { %2649 = vrcp.f32 %v1704_v10 }
 0x720   :  { %v2646_v46 = vpop.eup %2645 }
 0x721   :  { %v2648_v55 = vpop.eup %2647  ;;  %v1708_v7 = vmul.f32 %v2646_v46, %v2644_v42 }
 0x722   :  { %v1707_v24 = vmul.f32 %v2648_v55, %v3565_v39  ;;  %v2650_v51 = vpop.eup %2649  ;;  %v2021_v39 = vld [vmem:[%s3694_s0 + $0xe8] sm:$0xff] }
 0x724   :  { %v1709_v22 = vadd.f32 %v1708_v7, %v1707_v24 }
 0x726   :  { %2651 = vtanh.f32 %v1709_v22 }
 0x730   :  { %v2652_v53 = vpop.eup %2651 }
 0x731   :  { %v1711_v56 = vmul.f32 %v2652_v53, %v2650_v51 }
 0x733   :  { %2019 = vst [vmem:[%s3696_s4 + $0x30] sm:$0xff] %v1711_v56  ;;  %1848 = vmatmul.mubr.f32.vlgmr.msra.gmra.mrb[14].mxu0 %v1711_v56  ;;  %1919 = vmatmul.mubr.f32.vlgmr.msra.gmra.mrb[14].mxu1 %v1711_v56 }
 0x806   :  { %v1849_v15 = vpop.f32.mrb[14].mxu0  ;;  %v1920_v40 = vpop.f32.mrb[14].mxu1 }
 0x807   :  { %v1925_v20 = vadd.f32 %v2020_v3, %v1849_v15  ;;  %v1851_v35 = vpop.f32.mrb[15].mxu0  ;;  %v1922_v43 = vpop.f32.mrb[15].mxu1  ;;  %v1927_v63 = vadd.f32 %v2022_v54, %v1920_v40 }
 0x808   :  { %v1926_v30 = vadd.f32 %v2021_v39, %v1851_v35  ;;  %v1928_v50 = vadd.f32 %v2023_v4, %v1922_v43 }
 0x809   :  { %v2024_v58 = vmul.f32 -1.442695, %v1925_v20 }
 0x80a   :  { %v2025_v27 = vmul.f32 -1.442695, %v1926_v30  ;;  %v2026_v59 = vmul.f32 -1.442695, %v1928_v50 }
 0x80b   :  { %2653 = vpow2.f32 %v2024_v58 }
 0x80c   :  { %2655 = vpow2.f32 %v2025_v27 }
 0x80d   :  { %2657 = vpow2.f32 %v2026_v59 }
 0x80e   :  { %2659 = vtanh.f32 %v1927_v63 }
 0x815   :  { %v2654_v12 = vpop.eup %2653 }
 0x816   :  { %v2656_v9 = vpop.eup %2655  ;;  %v1932_v17 = vadd.f32 1.0, %v2654_v12 }
 0x817   :  { %v1938_v32 = vadd.f32 1.0, %v2656_v9  ;;  %v2658_v41 = vpop.eup %2657 }
 0x818   :  { %2661 = vrcp.f32 %v1932_v17  ;;  %v2660_v28 = vpop.eup %2659  ;;  %v1945_v1 = vadd.f32 1.0, %v2658_v41 }
 0x819   :  { %2663 = vrcp.f32 %v1938_v32 }
 0x81a   :  { %2665 = vrcp.f32 %v1945_v1 }
 0x822   :  { %v2662_v57 = vpop.eup %2661 }
 0x823   :  { %v2664_v60 = vpop.eup %2663  ;;  %v1949_v61 = vmul.f32 %v2662_v57, %v2660_v28 }
 0x824   :  { %v1948_v2 = vmul.f32 %v2664_v60, %v1709_v22  ;;  %v2666_v13 = vpop.eup %2665 }
 0x826   :  { %v1950_v5 = vadd.f32 %v1949_v61, %v1948_v2 }
 0x828   :  { %2667 = vtanh.f32 %v1950_v5  ;;  %1960 = vst [vmem:[%s3697_s5] sm:$0xff] %v1950_v5 }
 0x832   :  { %v2668_v8 = vpop.eup %2667 }
 0x833   :  { %v1952_v6 = vmul.f32 %v2668_v8, %v2666_v13 }
 0x835   :  { %2027 = vst [vmem:[%s3696_s4 + $0x38] sm:$0xff] %v1952_v6 }

</bundles_post_ra>
